<compile_context>
chip_gen: v7x
topology: tpu7x:2x2x1
jax: 0.10.0
libtpu: 0.0.40
codegen_flags: <defaults>
</compile_context>

<pallas_src>
import math

import numpy as np
import jax
import jax.numpy as jnp
from jax import lax
from jax.experimental import pallas as pl
from jax.experimental.pallas import tpu as pltpu

# MXU operand dtype.  bfloat16 halves weight VMEM / MXU push cycles; set to
# jnp.float32 for bit-accurate PyTorch-f32 semantics.
MXU_DTYPE = jnp.bfloat16

BATCH_TILE = 32  # samples processed per grid step


# ----------------------------------------------------------------------------
# Fused whole-network kernel
# ----------------------------------------------------------------------------
def _net_fwd_kernel(x_ref, w1b_ref, b1_ref, w2b_ref, b2_ref,
                    fw1_ref, fb1_ref, fw2_ref, fb2_ref, out_ref):
    tb = x_ref.shape[0]

    def mm(a, b):
        # rank-2 MXU matmul, bf16/f32 operands, f32 accumulation
        return jnp.dot(a.astype(MXU_DTYPE), b,
                       preferred_element_type=jnp.float32)

    x = x_ref[...]                                        # (tb, 28, 28) f32

    # --- conv1: banded over W, accumulated over the 5 kh row-shifts ---------
    # rows = (n, oh1) on sublanes, cols = (ow1, co) = 240 lanes (lane-dense)
    acc = None
    for kh in range(5):
        xs = x[:, kh:kh + 24, :].reshape(tb * 24, 28)     # cheap sublane shift
        t = mm(xs, w1b_ref[kh])                           # (tb*24, 240)
        acc = t if acc is None else acc + t
    y1 = jnp.maximum(acc + b1_ref[...], 0.0)              # relu, f32

    # --- pool1 (2x2), kept uncompacted ---------------------------------------
    # W-pairs: valid at even ow1 col-blocks; H-pairs: valid at even rows.
    pw = jnp.maximum(y1[:, :230], y1[:, 10:]).reshape(tb, 24, 230)
    p1 = jnp.maximum(pw[:, :23, :], pw[:, 1:, :])         # (tb, 23, 230)

    # --- conv2: banded over (ow1, ci), accumulated over the 5 kh taps --------
    # The stride-2 reads of the uncompacted pool1 layout are folded into w2b
    # (zero rows at invalid positions); kh taps are 2-row sublane shifts.
    acc2 = None
    for kh in range(5):
        ps = p1[:, 2 * kh:2 * kh + 15, :].reshape(tb * 15, 230)
        t = mm(ps, w2b_ref[kh])                           # (tb*15, 160)
        acc2 = t if acc2 is None else acc2 + t
    y2 = jnp.maximum(acc2 + b2_ref[...], 0.0)             # relu, f32

    # --- pool2 (2x2), kept uncompacted ---------------------------------------
    z = jnp.maximum(y2[:, :140], y2[:, 20:]).reshape(tb, 15, 140)
    p2 = jnp.maximum(z[:, :13, :], z[:, 2:, :])           # (tb, 13, 140)

    # --- head: fc1 (flatten + gather folded into the weight) -> relu ---------
    h = p2.reshape(tb, 13 * 140)                          # (tb, 1820)
    h = jnp.maximum(mm(h, fw1_ref[...]) + fb1_ref[...], 0.0)   # (tb, 200)

    # --- fc2 -> log_softmax ---------------------------------------------------
    logits = mm(h, fw2_ref[...]) + fb2_ref[...]           # (tb, 10)
    s = logits - jnp.max(logits, axis=-1, keepdims=True)
    res = s - jnp.log(jnp.sum(jnp.exp(s), axis=-1, keepdims=True))
    out_ref[...] = res[:, None, :]                        # (tb, 1, 10)


# ----------------------------------------------------------------------------
# Parameters (PyTorch layout) and one-time kernel-layout preparation
# ----------------------------------------------------------------------------
def init_params(key):
    """PyTorch-layout parameters, PyTorch-default uniform(+-1/sqrt(fan_in))."""
    def uniform(k, shape, fan_in):
        bound = 1.0 / math.sqrt(fan_in)
        return jax.random.uniform(k, shape, jnp.float32, -bound, bound)

    ks = jax.random.split(key, 8)
    return {
        "conv1_w": uniform(ks[0], (10, 1, 5, 5), 25),
        "conv1_b": uniform(ks[1], (10,), 25),
        "conv2_w": uniform(ks[2], (20, 10, 5, 5), 250),
        "conv2_b": uniform(ks[3], (20,), 250),
        "fc1_w": uniform(ks[4], (200, 320), 320),   # PyTorch Linear: (out, in)
        "fc1_b": uniform(ks[5], (200,), 320),
        "fc2_w": uniform(ks[6], (10, 200), 200),
        "fc2_b": uniform(ks[7], (10,), 200),
    }


def to_kernel_layout(p):
    """Build the banded matmul weights (done ONCE, outside the forward)."""
    w1 = np.asarray(p["conv1_w"], np.float32)    # (10, 1, 5, 5)  (co, ci, kh, kw)
    b1 = np.asarray(p["conv1_b"], np.float32)
    w2 = np.asarray(p["conv2_w"], np.float32)    # (20, 10, 5, 5) (co2, ci, kh, kw)
    b2 = np.asarray(p["conv2_b"], np.float32)
    fw1 = np.asarray(p["fc1_w"], np.float32)     # (200, 320)
    fb1 = np.asarray(p["fc1_b"], np.float32)
    fw2 = np.asarray(p["fc2_w"], np.float32)     # (10, 200)
    fb2 = np.asarray(p["fc2_b"], np.float32)

    # conv1 band: w1b[kh, w_in, 10*ow + co] = w1[co, 0, kh, w_in - ow]
    w1b = np.zeros((5, 28, 240), np.float32)
    for kh in range(5):
        for kw in range(5):
            for ow in range(24):
                w1b[kh, ow + kw, ow * 10:(ow + 1) * 10] = w1[:, 0, kh, kw]

    # conv2 band over the uncompacted pool1 layout (230 input cols):
    # w2b[kh, 10*ow1 + ci, 20*ow2 + co2] = w2[co2, ci, kh, kw], ow1 = 2*(ow2+kw)
    w2b = np.zeros((5, 230, 160), np.float32)
    for kh in range(5):
        for kw in range(5):
            for ow2 in range(8):
                ow1 = 2 * (ow2 + kw)
                w2b[kh, 10 * ow1:10 * ow1 + 10,
                    20 * ow2:20 * ow2 + 20] = w2[:, :, kh, kw].T   # (ci, co2)

    # fc1 over the uncompacted pool2 layout (13 rows x 140 cols per sample):
    # feature (c, ph, pw) (PyTorch flatten order c*16+ph*4+pw) sits at
    # row 4*ph, col 40*pw + c  ->  K index 560*ph + 40*pw + c.
    fw1b = np.zeros((13 * 140, 200), np.float32)
    for ph in range(4):
        for pw_ in range(4):
            for c in range(20):
                fw1b[560 * ph + 40 * pw_ + c, :] = fw1[:, c * 16 + ph * 4 + pw_]

    return {
        "w1b": jnp.asarray(w1b, MXU_DTYPE),
        "b1": jnp.asarray(np.tile(b1, 24)[None, :], jnp.float32),   # (1, 240)
        "w2b": jnp.asarray(w2b, MXU_DTYPE),
        "b2": jnp.asarray(np.tile(b2, 8)[None, :], jnp.float32),    # (1, 160)
        "fw1": jnp.asarray(fw1b, MXU_DTYPE),
        "fb1": jnp.asarray(fb1[None, :], jnp.float32),              # (1, 200)
        "fw2": jnp.asarray(fw2.T, MXU_DTYPE),                       # (200, 10)
        "fb2": jnp.asarray(fb2[None, :], jnp.float32),              # (1, 10)
    }


# ----------------------------------------------------------------------------
# Forward pass (single pallas_call)
# ----------------------------------------------------------------------------
def net_forward(kp, x):
    n = x.shape[0]
    assert x.shape[1:] == (1, 28, 28), x.shape
    x = x.reshape(n, 28, 28)                 # Cin == 1: contiguous (free) reshape

    # >= 2 grid steps whenever possible so both v7x TensorCores get work.
    tb = int(min(BATCH_TILE, max(1, pl.cdiv(n, 2))))
    grid = (pl.cdiv(n, tb),)

    weights = (kp["w1b"], kp["b1"], kp["w2b"], kp["b2"],
               kp["fw1"], kp["fb1"], kp["fw2"], kp["fb2"])

    def resident(a):
        nd = a.ndim
        return pl.BlockSpec(a.shape, lambda *_: (0,) * nd)  # stays in VMEM

    in_specs = ([pl.BlockSpec((tb, 28, 28), lambda i: (i, 0, 0))]
                + [resident(a) for a in weights])

    out = pl.pallas_call(
        _net_fwd_kernel,
        out_shape=jax.ShapeDtypeStruct((n, 1, 10), jnp.float32),
        grid=grid,
        in_specs=in_specs,
        out_specs=pl.BlockSpec((tb, 1, 10), lambda i: (i, 0, 0)),
        compiler_params=pltpu.CompilerParams(
            dimension_semantics=("parallel",),          # megacore sharding
            vmem_limit_bytes=48 * 1024 * 1024),         # explicit VMEM budget
    )(x, *weights)
    return out.reshape(n, 10)


# ----------------------------------------------------------------------------
# Pure-XLA reference (from PyTorch-layout params) for validation
# ----------------------------------------------------------------------------
def reference_forward(p, x):
    dn = ("NCHW", "OIHW", "NCHW")
    hp = lax.Precision.HIGHEST
    y = lax.conv_general_dilated(x, p["conv1_w"], (1, 1), "VALID",
                                 dimension_numbers=dn, precision=hp)
    y = jax.nn.relu(y + p["conv1_b"].reshape(1, -1, 1, 1))
    y = lax.reduce_window(y, -jnp.inf, lax.max, (1, 1, 2, 2), (1, 1, 2, 2), "VALID")
    y = lax.conv_general_dilated(y, p["conv2_w"], (1, 1), "VALID",
                                 dimension_numbers=dn, precision=hp)
    y = jax.nn.relu(y + p["conv2_b"].reshape(1, -1, 1, 1))
    y = lax.reduce_window(y, -jnp.inf, lax.max, (1, 1, 2, 2), (1, 1, 2, 2), "VALID")
    y = y.reshape(y.shape[0], 320)
    y = jax.nn.relu(jnp.dot(y, p["fc1_w"].T, precision=hp) + p["fc1_b"])
    y = jnp.dot(y, p["fc2_w"].T, precision=hp) + p["fc2_b"]
    return jax.nn.log_softmax(y, axis=-1)


if __name__ == "__main__":
    key = jax.random.PRNGKey(0)
    pkey, xkey = jax.random.split(key)
    torch_params = init_params(pkey)
    kparams = to_kernel_layout(torch_params)     # one-time layout prep

    # MNIST-shaped input (the 4*4*20 flatten implies 28x28 single-channel)
    x = jax.random.normal(xkey, (2, 1, 28, 28), dtype=jnp.float32)

    out = jax.jit(net_forward)(kparams, x)
    out = jax.block_until_ready(out)

    assert out.shape == (2, 10) and out.dtype == jnp.float32
    # rows of log_softmax exponentiate-and-sum to 1
    assert jnp.allclose(jnp.sum(jnp.exp(out), axis=1), 1.0, atol=1e-3)
    # cross-check against a pure-XLA implementation of the PyTorch forward;
    # tolerance gated on the MXU operand dtype (bf16 operands, f32 accum).
    ref = jax.jit(reference_forward)(torch_params, x)
    tol = 1e-3 if jnp.dtype(MXU_DTYPE) == jnp.dtype(jnp.float32) else 3e-2
    max_err = float(jnp.max(jnp.abs(out - ref)))
    assert max_err < tol, f"mismatch vs reference: {max_err} (tol {tol})"
    print("KERNEL_OK")
</pallas_src>

<mosaic_0001>
module attributes {stable_mosaic.version = 11 : i64} {
  func.func @_net_fwd_kernel(%arg0: i32, %arg1: memref<1x28x28xf32, #tpu.memory_space<vmem>>, %arg2: memref<5x28x240xbf16, #tpu.memory_space<vmem>>, %arg3: memref<1x240xf32, #tpu.memory_space<vmem>>, %arg4: memref<5x230x160xbf16, #tpu.memory_space<vmem>>, %arg5: memref<1x160xf32, #tpu.memory_space<vmem>>, %arg6: memref<1820x200xbf16, #tpu.memory_space<vmem>>, %arg7: memref<1x200xf32, #tpu.memory_space<vmem>>, %arg8: memref<200x10xbf16, #tpu.memory_space<vmem>>, %arg9: memref<1x10xf32, #tpu.memory_space<vmem>>, %arg10: memref<1x1x10xf32, #tpu.memory_space<vmem>>) attributes {dimension_semantics = [#tpu.dimension_semantics<parallel>], iteration_bounds = array<i64: 2>, scalar_prefetch = 0 : i64, scratch_operands = 0 : i64, tpu.core_type = #tpu.core_type<tc>, window_params = [{transform_indices = @transform_0, window_bounds = array<i64: 1, 28, 28>}, {pipeline_mode = #tpu.pipeline_mode<synchronous>, transform_indices = @transform_1, window_bounds = array<i64: 5, 28, 240>}, {pipeline_mode = #tpu.pipeline_mode<synchronous>, transform_indices = @transform_2, window_bounds = array<i64: 1, 240>}, {pipeline_mode = #tpu.pipeline_mode<synchronous>, transform_indices = @transform_3, window_bounds = array<i64: 5, 230, 160>}, {pipeline_mode = #tpu.pipeline_mode<synchronous>, transform_indices = @transform_4, window_bounds = array<i64: 1, 160>}, {pipeline_mode = #tpu.pipeline_mode<synchronous>, transform_indices = @transform_5, window_bounds = array<i64: 1820, 200>}, {pipeline_mode = #tpu.pipeline_mode<synchronous>, transform_indices = @transform_6, window_bounds = array<i64: 1, 200>}, {pipeline_mode = #tpu.pipeline_mode<synchronous>, transform_indices = @transform_7, window_bounds = array<i64: 200, 10>}, {pipeline_mode = #tpu.pipeline_mode<synchronous>, transform_indices = @transform_8, window_bounds = array<i64: 1, 10>}, {transform_indices = @transform_9, window_bounds = array<i64: 1, 1, 10>}]} {
    %c0 = arith.constant 0 : index
    %c0_0 = arith.constant 0 : index
    %c0_1 = arith.constant 0 : index
    %0 = vector.load %arg1[%c0, %c0_0, %c0_1] : memref<1x28x28xf32, #tpu.memory_space<vmem>>, vector<1x28x28xf32>
    %1 = vector.extract_strided_slice %0 {offsets = [0, 0, 0], sizes = [1, 24, 28], strides = [1, 1, 1]} : vector<1x28x28xf32> to vector<1x24x28xf32>
    %2 = vector.shape_cast %1 : vector<1x24x28xf32> to vector<24x28xf32>
    %c0_2 = arith.constant 0 : index
    %c0_3 = arith.constant 0 : index
    %c0_4 = arith.constant 0 : index
    %3 = vector.load %arg2[%c0_2, %c0_3, %c0_4] : memref<5x28x240xbf16, #tpu.memory_space<vmem>>, vector<1x28x240xbf16>
    %4 = vector.shape_cast %3 : vector<1x28x240xbf16> to vector<28x240xbf16>
    %5 = arith.truncf %2 : vector<24x28xf32> to vector<24x28xbf16>
    %cst = arith.constant dense<0.000000e+00> : vector<24x240xf32>
    %6 = tpu.matmul %5, %4, %cst {dimension_numbers = #tpu.dot_dimension_numbers<[1], [0], [0], [1], [0, 0, 1, 1], [], []>} : vector<24x28xbf16>, vector<28x240xbf16>, vector<24x240xf32> -> vector<24x240xf32>
    %7 = vector.extract_strided_slice %0 {offsets = [0, 1, 0], sizes = [1, 24, 28], strides = [1, 1, 1]} : vector<1x28x28xf32> to vector<1x24x28xf32>
    %8 = vector.shape_cast %7 : vector<1x24x28xf32> to vector<24x28xf32>
    %c1 = arith.constant 1 : index
    %c0_5 = arith.constant 0 : index
    %c0_6 = arith.constant 0 : index
    %9 = vector.load %arg2[%c1, %c0_5, %c0_6] : memref<5x28x240xbf16, #tpu.memory_space<vmem>>, vector<1x28x240xbf16>
    %10 = vector.shape_cast %9 : vector<1x28x240xbf16> to vector<28x240xbf16>
    %11 = arith.truncf %8 : vector<24x28xf32> to vector<24x28xbf16>
    %cst_7 = arith.constant dense<0.000000e+00> : vector<24x240xf32>
    %12 = tpu.matmul %11, %10, %cst_7 {dimension_numbers = #tpu.dot_dimension_numbers<[1], [0], [0], [1], [0, 0, 1, 1], [], []>} : vector<24x28xbf16>, vector<28x240xbf16>, vector<24x240xf32> -> vector<24x240xf32>
    %13 = arith.addf %6, %12 : vector<24x240xf32>
    %14 = vector.extract_strided_slice %0 {offsets = [0, 2, 0], sizes = [1, 24, 28], strides = [1, 1, 1]} : vector<1x28x28xf32> to vector<1x24x28xf32>
    %15 = vector.shape_cast %14 : vector<1x24x28xf32> to vector<24x28xf32>
    %c2 = arith.constant 2 : index
    %c0_8 = arith.constant 0 : index
    %c0_9 = arith.constant 0 : index
    %16 = vector.load %arg2[%c2, %c0_8, %c0_9] : memref<5x28x240xbf16, #tpu.memory_space<vmem>>, vector<1x28x240xbf16>
    %17 = vector.shape_cast %16 : vector<1x28x240xbf16> to vector<28x240xbf16>
    %18 = arith.truncf %15 : vector<24x28xf32> to vector<24x28xbf16>
    %cst_10 = arith.constant dense<0.000000e+00> : vector<24x240xf32>
    %19 = tpu.matmul %18, %17, %cst_10 {dimension_numbers = #tpu.dot_dimension_numbers<[1], [0], [0], [1], [0, 0, 1, 1], [], []>} : vector<24x28xbf16>, vector<28x240xbf16>, vector<24x240xf32> -> vector<24x240xf32>
    %20 = arith.addf %13, %19 : vector<24x240xf32>
    %21 = vector.extract_strided_slice %0 {offsets = [0, 3, 0], sizes = [1, 24, 28], strides = [1, 1, 1]} : vector<1x28x28xf32> to vector<1x24x28xf32>
    %22 = vector.shape_cast %21 : vector<1x24x28xf32> to vector<24x28xf32>
    %c3 = arith.constant 3 : index
    %c0_11 = arith.constant 0 : index
    %c0_12 = arith.constant 0 : index
    %23 = vector.load %arg2[%c3, %c0_11, %c0_12] : memref<5x28x240xbf16, #tpu.memory_space<vmem>>, vector<1x28x240xbf16>
    %24 = vector.shape_cast %23 : vector<1x28x240xbf16> to vector<28x240xbf16>
    %25 = arith.truncf %22 : vector<24x28xf32> to vector<24x28xbf16>
    %cst_13 = arith.constant dense<0.000000e+00> : vector<24x240xf32>
    %26 = tpu.matmul %25, %24, %cst_13 {dimension_numbers = #tpu.dot_dimension_numbers<[1], [0], [0], [1], [0, 0, 1, 1], [], []>} : vector<24x28xbf16>, vector<28x240xbf16>, vector<24x240xf32> -> vector<24x240xf32>
    %27 = arith.addf %20, %26 : vector<24x240xf32>
    %28 = vector.extract_strided_slice %0 {offsets = [0, 4, 0], sizes = [1, 24, 28], strides = [1, 1, 1]} : vector<1x28x28xf32> to vector<1x24x28xf32>
    %29 = vector.shape_cast %28 : vector<1x24x28xf32> to vector<24x28xf32>
    %c4 = arith.constant 4 : index
    %c0_14 = arith.constant 0 : index
    %c0_15 = arith.constant 0 : index
    %30 = vector.load %arg2[%c4, %c0_14, %c0_15] : memref<5x28x240xbf16, #tpu.memory_space<vmem>>, vector<1x28x240xbf16>
    %31 = vector.shape_cast %30 : vector<1x28x240xbf16> to vector<28x240xbf16>
    %32 = arith.truncf %29 : vector<24x28xf32> to vector<24x28xbf16>
    %cst_16 = arith.constant dense<0.000000e+00> : vector<24x240xf32>
    %33 = tpu.matmul %32, %31, %cst_16 {dimension_numbers = #tpu.dot_dimension_numbers<[1], [0], [0], [1], [0, 0, 1, 1], [], []>} : vector<24x28xbf16>, vector<28x240xbf16>, vector<24x240xf32> -> vector<24x240xf32>
    %34 = arith.addf %27, %33 : vector<24x240xf32>
    %c0_17 = arith.constant 0 : index
    %c0_18 = arith.constant 0 : index
    %35 = vector.load %arg3[%c0_17, %c0_18] : memref<1x240xf32, #tpu.memory_space<vmem>>, vector<1x240xf32>
    %36 = vector.broadcast %35 : vector<1x240xf32> to vector<24x240xf32>
    %37 = arith.addf %34, %36 : vector<24x240xf32>
    %cst_19 = arith.constant 0.000000e+00 : f32
    %38 = vector.broadcast %cst_19 : f32 to vector<24x240xf32>
    %39 = arith.maximumf %37, %38 : vector<24x240xf32>
    %40 = vector.extract_strided_slice %39 {offsets = [0, 0], sizes = [24, 230], strides = [1, 1]} : vector<24x240xf32> to vector<24x230xf32>
    %41 = vector.extract_strided_slice %39 {offsets = [0, 10], sizes = [24, 230], strides = [1, 1]} : vector<24x240xf32> to vector<24x230xf32>
    %42 = arith.maximumf %40, %41 : vector<24x230xf32>
    %43 = vector.shape_cast %42 : vector<24x230xf32> to vector<1x24x230xf32>
    %44 = vector.extract_strided_slice %43 {offsets = [0, 0, 0], sizes = [1, 23, 230], strides = [1, 1, 1]} : vector<1x24x230xf32> to vector<1x23x230xf32>
    %45 = vector.extract_strided_slice %43 {offsets = [0, 1, 0], sizes = [1, 23, 230], strides = [1, 1, 1]} : vector<1x24x230xf32> to vector<1x23x230xf32>
    %46 = arith.maximumf %44, %45 : vector<1x23x230xf32>
    %47 = vector.extract_strided_slice %46 {offsets = [0, 0, 0], sizes = [1, 15, 230], strides = [1, 1, 1]} : vector<1x23x230xf32> to vector<1x15x230xf32>
    %48 = vector.shape_cast %47 : vector<1x15x230xf32> to vector<15x230xf32>
    %c0_20 = arith.constant 0 : index
    %c0_21 = arith.constant 0 : index
    %c0_22 = arith.constant 0 : index
    %49 = vector.load %arg4[%c0_20, %c0_21, %c0_22] : memref<5x230x160xbf16, #tpu.memory_space<vmem>>, vector<1x230x160xbf16>
    %50 = vector.shape_cast %49 : vector<1x230x160xbf16> to vector<230x160xbf16>
    %51 = arith.truncf %48 : vector<15x230xf32> to vector<15x230xbf16>
    %cst_23 = arith.constant dense<0.000000e+00> : vector<15x160xf32>
    %52 = tpu.matmul %51, %50, %cst_23 {dimension_numbers = #tpu.dot_dimension_numbers<[1], [0], [0], [1], [0, 0, 1, 1], [], []>} : vector<15x230xbf16>, vector<230x160xbf16>, vector<15x160xf32> -> vector<15x160xf32>
    %53 = vector.extract_strided_slice %46 {offsets = [0, 2, 0], sizes = [1, 15, 230], strides = [1, 1, 1]} : vector<1x23x230xf32> to vector<1x15x230xf32>
    %54 = vector.shape_cast %53 : vector<1x15x230xf32> to vector<15x230xf32>
    %c1_24 = arith.constant 1 : index
    %c0_25 = arith.constant 0 : index
    %c0_26 = arith.constant 0 : index
    %55 = vector.load %arg4[%c1_24, %c0_25, %c0_26] : memref<5x230x160xbf16, #tpu.memory_space<vmem>>, vector<1x230x160xbf16>
    %56 = vector.shape_cast %55 : vector<1x230x160xbf16> to vector<230x160xbf16>
    %57 = arith.truncf %54 : vector<15x230xf32> to vector<15x230xbf16>
    %cst_27 = arith.constant dense<0.000000e+00> : vector<15x160xf32>
    %58 = tpu.matmul %57, %56, %cst_27 {dimension_numbers = #tpu.dot_dimension_numbers<[1], [0], [0], [1], [0, 0, 1, 1], [], []>} : vector<15x230xbf16>, vector<230x160xbf16>, vector<15x160xf32> -> vector<15x160xf32>
    %59 = arith.addf %52, %58 : vector<15x160xf32>
    %60 = vector.extract_strided_slice %46 {offsets = [0, 4, 0], sizes = [1, 15, 230], strides = [1, 1, 1]} : vector<1x23x230xf32> to vector<1x15x230xf32>
    %61 = vector.shape_cast %60 : vector<1x15x230xf32> to vector<15x230xf32>
    %c2_28 = arith.constant 2 : index
    %c0_29 = arith.constant 0 : index
    %c0_30 = arith.constant 0 : index
    %62 = vector.load %arg4[%c2_28, %c0_29, %c0_30] : memref<5x230x160xbf16, #tpu.memory_space<vmem>>, vector<1x230x160xbf16>
    %63 = vector.shape_cast %62 : vector<1x230x160xbf16> to vector<230x160xbf16>
    %64 = arith.truncf %61 : vector<15x230xf32> to vector<15x230xbf16>
    %cst_31 = arith.constant dense<0.000000e+00> : vector<15x160xf32>
    %65 = tpu.matmul %64, %63, %cst_31 {dimension_numbers = #tpu.dot_dimension_numbers<[1], [0], [0], [1], [0, 0, 1, 1], [], []>} : vector<15x230xbf16>, vector<230x160xbf16>, vector<15x160xf32> -> vector<15x160xf32>
    %66 = arith.addf %59, %65 : vector<15x160xf32>
    %67 = vector.extract_strided_slice %46 {offsets = [0, 6, 0], sizes = [1, 15, 230], strides = [1, 1, 1]} : vector<1x23x230xf32> to vector<1x15x230xf32>
    %68 = vector.shape_cast %67 : vector<1x15x230xf32> to vector<15x230xf32>
    %c3_32 = arith.constant 3 : index
    %c0_33 = arith.constant 0 : index
    %c0_34 = arith.constant 0 : index
    %69 = vector.load %arg4[%c3_32, %c0_33, %c0_34] : memref<5x230x160xbf16, #tpu.memory_space<vmem>>, vector<1x230x160xbf16>
    %70 = vector.shape_cast %69 : vector<1x230x160xbf16> to vector<230x160xbf16>
    %71 = arith.truncf %68 : vector<15x230xf32> to vector<15x230xbf16>
    %cst_35 = arith.constant dense<0.000000e+00> : vector<15x160xf32>
    %72 = tpu.matmul %71, %70, %cst_35 {dimension_numbers = #tpu.dot_dimension_numbers<[1], [0], [0], [1], [0, 0, 1, 1], [], []>} : vector<15x230xbf16>, vector<230x160xbf16>, vector<15x160xf32> -> vector<15x160xf32>
    %73 = arith.addf %66, %72 : vector<15x160xf32>
    %74 = vector.extract_strided_slice %46 {offsets = [0, 8, 0], sizes = [1, 15, 230], strides = [1, 1, 1]} : vector<1x23x230xf32> to vector<1x15x230xf32>
    %75 = vector.shape_cast %74 : vector<1x15x230xf32> to vector<15x230xf32>
    %c4_36 = arith.constant 4 : index
    %c0_37 = arith.constant 0 : index
    %c0_38 = arith.constant 0 : index
    %76 = vector.load %arg4[%c4_36, %c0_37, %c0_38] : memref<5x230x160xbf16, #tpu.memory_space<vmem>>, vector<1x230x160xbf16>
    %77 = vector.shape_cast %76 : vector<1x230x160xbf16> to vector<230x160xbf16>
    %78 = arith.truncf %75 : vector<15x230xf32> to vector<15x230xbf16>
    %cst_39 = arith.constant dense<0.000000e+00> : vector<15x160xf32>
    %79 = tpu.matmul %78, %77, %cst_39 {dimension_numbers = #tpu.dot_dimension_numbers<[1], [0], [0], [1], [0, 0, 1, 1], [], []>} : vector<15x230xbf16>, vector<230x160xbf16>, vector<15x160xf32> -> vector<15x160xf32>
    %80 = arith.addf %73, %79 : vector<15x160xf32>
    %c0_40 = arith.constant 0 : index
    %c0_41 = arith.constant 0 : index
    %81 = vector.load %arg5[%c0_40, %c0_41] : memref<1x160xf32, #tpu.memory_space<vmem>>, vector<1x160xf32>
    %82 = vector.broadcast %81 : vector<1x160xf32> to vector<15x160xf32>
    %83 = arith.addf %80, %82 : vector<15x160xf32>
    %cst_42 = arith.constant 0.000000e+00 : f32
    %84 = vector.broadcast %cst_42 : f32 to vector<15x160xf32>
    %85 = arith.maximumf %83, %84 : vector<15x160xf32>
    %86 = vector.extract_strided_slice %85 {offsets = [0, 0], sizes = [15, 140], strides = [1, 1]} : vector<15x160xf32> to vector<15x140xf32>
    %87 = vector.extract_strided_slice %85 {offsets = [0, 20], sizes = [15, 140], strides = [1, 1]} : vector<15x160xf32> to vector<15x140xf32>
    %88 = arith.maximumf %86, %87 : vector<15x140xf32>
    %89 = vector.shape_cast %88 : vector<15x140xf32> to vector<1x15x140xf32>
    %90 = vector.extract_strided_slice %89 {offsets = [0, 0, 0], sizes = [1, 13, 140], strides = [1, 1, 1]} : vector<1x15x140xf32> to vector<1x13x140xf32>
    %91 = vector.extract_strided_slice %89 {offsets = [0, 2, 0], sizes = [1, 13, 140], strides = [1, 1, 1]} : vector<1x15x140xf32> to vector<1x13x140xf32>
    %92 = arith.maximumf %90, %91 : vector<1x13x140xf32>
    %93 = vector.shape_cast %92 : vector<1x13x140xf32> to vector<1x1820xf32>
    %c0_43 = arith.constant 0 : index
    %c0_44 = arith.constant 0 : index
    %94 = vector.load %arg6[%c0_43, %c0_44] : memref<1820x200xbf16, #tpu.memory_space<vmem>>, vector<1820x200xbf16>
    %95 = arith.truncf %93 : vector<1x1820xf32> to vector<1x1820xbf16>
    %cst_45 = arith.constant dense<0.000000e+00> : vector<1x200xf32>
    %96 = tpu.matmul %95, %94, %cst_45 {dimension_numbers = #tpu.dot_dimension_numbers<[1], [0], [0], [1], [0, 0, 1, 1], [], []>} : vector<1x1820xbf16>, vector<1820x200xbf16>, vector<1x200xf32> -> vector<1x200xf32>
    %c0_46 = arith.constant 0 : index
    %c0_47 = arith.constant 0 : index
    %97 = vector.load %arg7[%c0_46, %c0_47] : memref<1x200xf32, #tpu.memory_space<vmem>>, vector<1x200xf32>
    %98 = arith.addf %96, %97 : vector<1x200xf32>
    %cst_48 = arith.constant 0.000000e+00 : f32
    %99 = vector.broadcast %cst_48 : f32 to vector<1x200xf32>
    %100 = arith.maximumf %98, %99 : vector<1x200xf32>
    %c0_49 = arith.constant 0 : index
    %c0_50 = arith.constant 0 : index
    %101 = vector.load %arg8[%c0_49, %c0_50] : memref<200x10xbf16, #tpu.memory_space<vmem>>, vector<200x10xbf16>
    %102 = arith.truncf %100 : vector<1x200xf32> to vector<1x200xbf16>
    %cst_51 = arith.constant dense<0.000000e+00> : vector<1x10xf32>
    %103 = tpu.matmul %102, %101, %cst_51 {dimension_numbers = #tpu.dot_dimension_numbers<[1], [0], [0], [1], [0, 0, 1, 1], [], []>} : vector<1x200xbf16>, vector<200x10xbf16>, vector<1x10xf32> -> vector<1x10xf32>
    %c0_52 = arith.constant 0 : index
    %c0_53 = arith.constant 0 : index
    %104 = vector.load %arg9[%c0_52, %c0_53] : memref<1x10xf32, #tpu.memory_space<vmem>>, vector<1x10xf32>
    %105 = arith.addf %103, %104 : vector<1x10xf32>
    %cst_54 = arith.constant dense<0xFF800000> : vector<1xf32>
    %106 = vector.multi_reduction <maximumf>, %105, %cst_54 [1] : vector<1x10xf32> to vector<1xf32>
    %107 = vector.shape_cast %106 : vector<1xf32> to vector<1x1xf32>
    %108 = vector.broadcast %107 : vector<1x1xf32> to vector<1x10xf32>
    %109 = arith.subf %105, %108 : vector<1x10xf32>
    %110 = math.exp %109 : vector<1x10xf32>
    %cst_55 = arith.constant dense<0.000000e+00> : vector<1xf32>
    %111 = vector.multi_reduction <add>, %110, %cst_55 [1] : vector<1x10xf32> to vector<1xf32>
    %112 = vector.shape_cast %111 : vector<1xf32> to vector<1x1xf32>
    %113 = math.log %112 : vector<1x1xf32>
    %114 = vector.broadcast %113 : vector<1x1xf32> to vector<1x10xf32>
    %115 = arith.subf %109, %114 : vector<1x10xf32>
    %116 = vector.shape_cast %115 : vector<1x10xf32> to vector<1x1x10xf32>
    %c0_56 = arith.constant 0 : index
    %c0_57 = arith.constant 0 : index
    %c0_58 = arith.constant 0 : index
    %117 = vector.load %arg10[%c0_56, %c0_57, %c0_58] : memref<1x1x10xf32, #tpu.memory_space<vmem>>, vector<1x1x10xf32>
    tpu.vector_store %arg10[%c0_56, %c0_57, %c0_58], %116 {strides = array<i32>} : memref<1x1x10xf32, #tpu.memory_space<vmem>>, vector<1x1x10xf32>,
    return
  }
  func.func @transform_0(%arg0: i32) -> (i32, i32, i32) {
    %c0_i32 = arith.constant 0 : i32
    %c0_i32_0 = arith.constant 0 : i32
    %c0_i32_1 = arith.constant 0 : i32
    return %arg0, %c0_i32, %c0_i32_0 : i32, i32, i32
  }
  func.func @transform_1(%arg0: i32) -> (i32, i32, i32) {
    %c0_i32 = arith.constant 0 : i32
    %c0_i32_0 = arith.constant 0 : i32
    %c0_i32_1 = arith.constant 0 : i32
    %c0_i32_2 = arith.constant 0 : i32
    return %c0_i32, %c0_i32_0, %c0_i32_1 : i32, i32, i32
  }
  func.func @transform_2(%arg0: i32) -> (i32, i32) {
    %c0_i32 = arith.constant 0 : i32
    %c0_i32_0 = arith.constant 0 : i32
    %c0_i32_1 = arith.constant 0 : i32
    return %c0_i32, %c0_i32_0 : i32, i32
  }
  func.func @transform_3(%arg0: i32) -> (i32, i32, i32) {
    %c0_i32 = arith.constant 0 : i32
    %c0_i32_0 = arith.constant 0 : i32
    %c0_i32_1 = arith.constant 0 : i32
    %c0_i32_2 = arith.constant 0 : i32
    return %c0_i32, %c0_i32_0, %c0_i32_1 : i32, i32, i32
  }
  func.func @transform_4(%arg0: i32) -> (i32, i32) {
    %c0_i32 = arith.constant 0 : i32
    %c0_i32_0 = arith.constant 0 : i32
    %c0_i32_1 = arith.constant 0 : i32
    return %c0_i32, %c0_i32_0 : i32, i32
  }
  func.func @transform_5(%arg0: i32) -> (i32, i32) {
    %c0_i32 = arith.constant 0 : i32
    %c0_i32_0 = arith.constant 0 : i32
    %c0_i32_1 = arith.constant 0 : i32
    return %c0_i32, %c0_i32_0 : i32, i32
  }
  func.func @transform_6(%arg0: i32) -> (i32, i32) {
    %c0_i32 = arith.constant 0 : i32
    %c0_i32_0 = arith.constant 0 : i32
    %c0_i32_1 = arith.constant 0 : i32
    return %c0_i32, %c0_i32_0 : i32, i32
  }
  func.func @transform_7(%arg0: i32) -> (i32, i32) {
    %c0_i32 = arith.constant 0 : i32
    %c0_i32_0 = arith.constant 0 : i32
    %c0_i32_1 = arith.constant 0 : i32
    return %c0_i32, %c0_i32_0 : i32, i32
  }
  func.func @transform_8(%arg0: i32) -> (i32, i32) {
    %c0_i32 = arith.constant 0 : i32
    %c0_i32_0 = arith.constant 0 : i32
    %c0_i32_1 = arith.constant 0 : i32
    return %c0_i32, %c0_i32_0 : i32, i32
  }
  func.func @transform_9(%arg0: i32) -> (i32, i32, i32) {
    %c0_i32 = arith.constant 0 : i32
    %c0_i32_0 = arith.constant 0 : i32
    %c0_i32_1 = arith.constant 0 : i32
    return %arg0, %c0_i32, %c0_i32_0 : i32, i32, i32
  }
}

</mosaic_0001>

<bundles_post_ra>
// kernel: net_forward.1
= control target key start
LH: loop header
LB: loop body
LE: loop exit
PB: predicated region body
PF: predicated region fallthrough
CT: control target
= control target key end

     0   :  { %14 = vsyncpa [#allocation3], 0  ;;  %s7557_s0 = inlined_call_operand.vmem [shape: f32[2,28,28], index: 0, kind: input, shape index: {}]   ;;  %s7558_s1 = inlined_call_operand.vmem [shape: bf16[5,28,240], index: 1, kind: input, shape index: {}]   ;;  %s7559_s2 = inlined_call_operand.vmem [shape: f32[1,240], index: 2, kind: input, shape index: {}]   ;;  %s7560_s3 = inlined_call_operand.vmem [shape: bf16[5,230,160], index: 3, kind: input, shape index: {}]   ;;  %s7561_s4 = inlined_call_operand.vmem [shape: f32[1,160], index: 4, kind: input, shape index: {}]   ;;  %s7562_s5 = inlined_call_operand.vmem [shape: bf16[1820,200], index: 5, kind: input, shape index: {}]   ;;  %s7563_s6 = inlined_call_operand.vmem [shape: f32[1,200], index: 6, kind: input, shape index: {}]   ;;  %s7564_s7 = inlined_call_operand.vmem [shape: bf16[200,10], index: 7, kind: input, shape index: {}]   ;;  %s7565_s8 = inlined_call_operand.vmem [shape: f32[1,10], index: 8, kind: input, shape index: {}]   ;;  %s7566_s9 = inlined_call_operand.hbm [shape: f32[2,1,10], index: 9, kind: output, shape index: {}]  }
   0x1   :  { %16 = vsyncpa [#allocation3 + $0x1], 0  ;;  %s5880_s30 = smov 0   ;;  %s5882_s10 = smov 0  }
   0x2   :  { %s5884_s11 = smov 0   ;;  %s5886_s12 = smov 0  }
   0x3 LB: > { %s5901_s13 = sadd.s32 4294967295, %s5810_s12   ;;  %s4392_s14 = sadd.s32 4294967294, %s5810_s12   ;;  %s5810_s12 = sphi %s5886_s12, %s7572_s12   ;;  %s5806_s11 = sphi %s5884_s11, %s7571_s11   ;;  %s5802_s10 = sphi %s5882_s10, %s7570_s10   ;;  %s5798_s30 = sphi %s5880_s30, %s7569_s30  }
   0x4   : > { %s5905_s15 = sadd.s32 1, %s5810_s12   ;;  %s223_s16 = sadd.s32 1, %s5806_s11 }
   0x5   : > { %s220_s17 = ssub.s32 %s5810_s12, %s5905_s15  ;;  %p233_p0 = scmp.ne.s32.totalorder %s5806_s11, %s5802_s10 }
   0x6   : > { %p221_p1 = scmp.eq.s32.totalorder %s220_s17, 0  ;;  %p234_p2 = scmp.eq.s32.totalorder %s5901_s13, 1 }
   0x7   : > { %p239_p3 = scmp.ne.s32.totalorder %s5802_s10, %s5798_s30  ;;  %p240_p4 = scmp.eq.s32.totalorder %s4392_s14, 1 }
   0x8   : > { %s5916_s18 = scalar_select %p221_p1, %s5806_s11, %s223_s16  }
   0x9   : > { %p5918_p5 = por %p234_p2, %p233_p0  ;;  %p5922_p6 = por %p240_p4, %p239_p3 }
   0xa   : > { %p4395_p7 = scmp.ge.s32.totalorder %s5810_s12, 1  ;;  %p290_p8 = scmp.lt.s32.totalorder %s5810_s12, 3 }
   0xc   : > { %p291_p9 = pnand %p4395_p7, %p290_p8 }
   0xd   : > { %v5139_v0 = vld [vmem:[%s7558_s1 + $0x44] ss:$8 sps:$4 sm:$0xff] (!%p291_p9)   ;;  %v5141_v1 = vld [vmem:[%s7558_s1 + $0x40] ss:$8 sps:$4 sm:$0xff] (!%p291_p9)   ;;  %v5812_v2 = vmov (!%p291_p9), 0   ;;  %p325_p10 = scmp.lt.s32.totalorder (!%p291_p9), %s5901_s13, 1 }
   0xe   : > { %294 = sbr.rel (%p291_p9) target bundleno = 2234 (0x8ba), region = 56  ;;  %599 = vmatprep.mubr.bf16.mxu0 (!%p291_p9), %v5812_v2  ;;  %427 = vmatprep.mubr.bf16.mxu1 (!%p291_p9), %v5812_v2  ;;  %v5142_v3 = vld [vmem:[%s7558_s1 + $0x24] ss:$8 sps:$4 sm:$0xff] (!%p291_p9)   ;;  %vm388_vm0 = vcmask (!%p291_p9), 1045504   ;;  %v5146_v5 = vld [vmem:[%s7558_s1 + $0x20] ss:$8 sps:$4 sm:$0xff] (!%p291_p9)  }
   0xf   : > { %567 = vmatprep.subr.bf16.mxu0 (!%p291_p9), %v5139_v0  ;;  %v5144_v4 = vld [vmem:[%s7558_s1 + $0x54] ss:$8 sps:$4 sm:$0x3f] (!%p291_p9)   ;;  %395 = vmatprep.subr.bf16.mxu1 (!%p291_p9), %v5142_v3  ;;  %v5147_v6 = vld [vmem:[%s7558_s1 + $0x50] ss:$8 sps:$4 sm:$0x3f] (!%p291_p9)  }
  0x10   : > { %568 = vmatpush1.bf16.msra.mxu0 (!%p291_p9), %v5141_v1  ;;  %396 = vmatpush1.bf16.msra.mxu1 (!%p291_p9), %v5146_v5  ;;  %v5148_v7 = vld [vmem:[%s7558_s1 + $0x34] ss:$8 sps:$4 sm:$0x3f] (!%p291_p9)   ;;  %v562_v8 = vsel (!%p291_p9), %vm388_vm0, %v5147_v6, 0  ;;  %v5152_v9 = vld [vmem:[%s7558_s1 + $0x64] ss:$8 sps:$4 sm:$0xff] (!%p291_p9)  }
  0x11   : > { %4424 = vmatprep.subr.msk.bf16.mxu0 (!%p291_p9), %vm388_vm0, %v5144_v4  ;;  %4406 = vmatprep.subr.msk.bf16.mxu1 (!%p291_p9), %vm388_vm0, %v5148_v7  ;;  %v5153_v10 = vld [vmem:[%s7558_s1 + $0x30] ss:$8 sps:$4 sm:$0x3f] (!%p291_p9)   ;;  %vm381_vm1 = vcmask (!%p291_p9), 228352   ;;  %vm533_vm2 = vcmask (!%p291_p9), 1046528   ;;  %s5813_s26 = smov (!%p291_p9), 118  }
  0x12   : > { %v390_v16 = vsel (!%p291_p9), %vm388_vm0, %v5153_v10, 0  ;;  %v5154_v21 = vld [vmem:[%s7558_s1 + $0x74] ss:$8 sps:$4 sm:$0x3f] (!%p291_p9)   ;;  %v5150_v24 = vld [vmem:[%s7558_s1 + $0x60] ss:$8 sps:$4 sm:$0xff] (!%p291_p9)  }
  0x13   : > { %v5156_v22 = vld [vmem:[%s7558_s1 + $0x70] ss:$8 sps:$4 sm:$0x3f] (!%p291_p9)   ;;  %v5159_v26 = vld [vmem:[%s7558_s1 + $0x4] ss:$8 sps:$4 sm:$0xff] (!%p291_p9)   ;;  %vm1130_vm5 = vcmask (!%p291_p9), 1042432  }
  0x14   : > { %570 = vmatpush1.bf16.msra.mxu0 (!%p291_p9), %v562_v8  ;;  %398 = vmatpush1.bf16.msra.mxu1 (!%p291_p9), %v390_v16  ;;  %vm347_vm3 = vsmask.f32 (!%p291_p9), 7424  ;;  %v5157_v30 = vld [vmem:[%s7558_s1] ss:$8 sps:$4 sm:$0xff] (!%p291_p9)   ;;  %v662_v36 = vsel (!%p291_p9), %vm388_vm0, %v5156_v22, 0  ;;  %vm862_vm6 = vcmask (!%p291_p9), 965632  }
  0x15   : > { %s326_s21 = scalar_select %p325_p10, %s5901_s13, 1  ;;  %667 = vmatprep.subr.bf16.mxu0 %v5152_v9  ;;  %475 = vmatprep.subr.bf16.mxu1 %v5159_v26  ;;  %v5160_v32 = vld [vmem:[%s7558_s1 + $0x14] ss:$8 sps:$4 sm:$0x3f]   ;;  %v5164_v37 = vld [vmem:[%s7558_s1 + $0x84] ss:$8 sps:$4 sm:$0xff]  }
  0x16   : > { %v5165_v34 = vld [vmem:[%s7558_s1 + $0x10] ss:$8 sps:$4 sm:$0x3f]   ;;  %vm629_vm4 = vsmask.f32 6400  ;;  %vm1126_vm7 = vcmask 834560  }
  0x17   : > { %s4972_s24 = sshll.u32 %s326_s21, 5  ;;  %v470_v42 = vsel %vm388_vm0, %v5165_v34, 0  ;;  %v5162_v46 = vld [vmem:[%s7558_s1 + $0x80] ss:$8 sps:$4 sm:$0xff]   ;;  %v5171_v56 = vld [vmem:[%s7560_s3 + $0xec] ss:$8 sps:$4 sm:$0xff]  }
  0x18   : > { %s329_s29 = scalar_lea.vmem %s7557_s0, %s4972_s24  ;;  %v5166_v47 = vld [vmem:[%s7558_s1 + $0x94] ss:$8 sps:$4 sm:$0x3f]   ;;  %v5168_v48 = vld [vmem:[%s7558_s1 + $0x90] ss:$8 sps:$4 sm:$0x3f]  }
  0x19   : > { %v331_v11 = vld [vmem:[%s329_s29] sm:$0xff]  ;;  %v332_v12 = vld [vmem:[%s329_s29 + $0x8] sm:$0xff]  ;;  %v5965_v13 = vld [vmem:[%s329_s29 + $0x10] sm:$0xff]  ;;  %v758_v50 = vsel %vm388_vm0, %v5168_v48, 0  ;;  %vm1645_vm8 = vcmask 1044480   ;;  %s5814_s25 = smov 108  }
  0x1a   : > { %v334_v14 = vld [vmem:[%s329_s29 + $0x18] sm:$0xf]  ;;  %v5967_v15 = vpack.c.bf16 %v332_v12, %v331_v11  ;;  %v340_v51 = vpack.c.bf16 %v5965_v13, %v5965_v13  ;;  %v5169_v55 = vld [vmem:[%s7560_s3 + $0xe8] ss:$8 sps:$4 sm:$0xff]   ;;  %v5174_v57 = vld [vmem:[%s7560_s3 + $0xfc] ss:$8 sps:$4 sm:$0xff]  }
  0x1b   : > { %v5971_v17 = vpack.c.bf16 %v334_v14, %v5965_v13  ;;  %v5172_v58 = vld [vmem:[%s7560_s3 + $0xf8] ss:$8 sps:$4 sm:$0xff]   ;;  %v5177_v59 = vld [vmem:[%s7560_s3 + $0x10c] ss:$8 sps:$4 sm:$0xff]   ;;  %v5175_v60 = vld [vmem:[%s7560_s3 + $0x108] ss:$8 sps:$4 sm:$0xff]  }
  0x1c   : > { %v534_v18 = vrot.slane %v5967_v15, 1  ;;  %v349_v19 = vshrl.u32 %v5967_v15, 16  ;;  %v351_v20 = vshll.u32 %v5967_v15, 16  ;;  %v730_v52 = vrot.slane %v5967_v15, 2  ;;  %v5180_v61 = vld [vmem:[%s7560_s3 + $0x11c] ss:$8 sps:$4 sm:$0xff]  }
  0x1d   : > { %v535_v23 = vrot.slane %v5971_v17, 1  ;;  %v356_v25 = vshll.u32 %v5971_v17, 16  ;;  %v360_v33 = vshrl.u32 %v5971_v17, 16  ;;  %v731_v53 = vrot.slane %v5971_v17, 2  ;;  %v5178_v62 = vld [vmem:[%s7560_s3 + $0x118] ss:$8 sps:$4 sm:$0xff]  }
  0x1e   : > { %v353_v27 = vrot.slane %v351_v20, 1  ;;  %v630_v38 = vrot.slane %v349_v19, 1  ;;  %v631_v39 = vrot.slane %v351_v20, 2  ;;  %v5183_v63 = vld [vmem:[%s7560_s3 + $0x12c] ss:$8 sps:$4 sm:$0xff]   ;;  %vm2119_vm9 = vcmask 883712  }
  0x1f   : > { %v536_v28 = vsel %vm533_vm2, %v534_v18, %v535_v23  ;;  %v358_v29 = vrot.slane %v356_v25, 1  ;;  %v634_v40 = vrot.slane %v356_v25, 2  ;;  %v633_v41 = vrot.slane %v360_v33, 1  ;;  %v5181_v0 = vld [vmem:[%s7560_s3 + $0x128] ss:$8 sps:$4 sm:$0xff]   ;;  %s5818_s23 = smov 12  }
  0x20   : > { %4425 = vmatmul.mubr.msk.bf16.vlgmr.msra.gmra.mrb[0].mxu0 %vm381_vm1, %v536_v28  ;;  %v354_v31 = vor.u32 %v353_v27, %v349_v19  ;;  %v632_v44 = vor.u32 %v631_v39, %v630_v38  ;;  %v732_v54 = vsel %vm388_vm0, %v730_v52, %v731_v53  ;;  %v5186_v1 = vld [vmem:[%s7560_s3 + $0x13c] ss:$8 sps:$4 sm:$0xff]   ;;  %v5184_v3 = vld [vmem:[%s7560_s3 + $0x138] ss:$8 sps:$4 sm:$0xff]   ;;  %v5189_v4 = vld [vmem:[%s7560_s3 + $0x14c] ss:$8 sps:$4 sm:$0xff]  }
  0x21   : > { %668 = vmatpush1.bf16.msra.mxu0 %v5150_v24  ;;  %609 = vmatprep.mubr.bf16.mxu0 %v5812_v2  ;;  %v362_v43 = vor.u32 %v360_v33, %v358_v29  ;;  %v635_v45 = vor.u32 %v634_v40, %v633_v41  ;;  %v5187_v5 = vld [vmem:[%s7560_s3 + $0x148] ss:$8 sps:$4 sm:$0xff]   ;;  %v5192_v6 = vld [vmem:[%s7560_s3 + $0x15c] ss:$8 sps:$4 sm:$0xff]   ;;  %v5190_v7 = vld [vmem:[%s7560_s3 + $0x158] ss:$8 sps:$4 sm:$0xff]  }
  0x22   : > { %v359_v35 = vsel %vm347_vm3, %v354_v31, %v358_v29  ;;  %4435 = vmatprep.subr.msk.bf16.mxu0 %vm388_vm0, %v5154_v21  ;;  %v5195_v8 = vld [vmem:[%s7560_s3 + $0x16c] ss:$8 sps:$4 sm:$0xff]   ;;  %v5193_v9 = vld [vmem:[%s7560_s3 + $0x168] ss:$8 sps:$4 sm:$0xff]   ;;  %v5198_v10 = vld [vmem:[%s7560_s3 + $0x17c] ss:$8 sps:$4 sm:$0xff]   ;;  %v822_v21 = vlaneseq }
  0x23   : > { %4407 = vmatmul.mubr.msk.bf16.vlgmr.msra.gmra.mrb[0].mxu1 %vm381_vm1, %v359_v35  ;;  %v636_v49 = vsel %vm629_vm4, %v632_v44, %v635_v45  ;;  %v5196_v11 = vld [vmem:[%s7560_s3 + $0x178] ss:$8 sps:$4 sm:$0xff]   ;;  %v5201_v38 = vld [vmem:[%s7560_s3 + $0x18c] ss:$8 sps:$4 sm:$0xff]   ;;  %v5199_v41 = vld [vmem:[%s7560_s3 + $0x188] ss:$8 sps:$4 sm:$0xff]  }
  0x24   : > { %437 = vmatprep.mubr.bf16.mxu1 %v5812_v2  ;;  %476 = vmatpush1.bf16.msra.mxu1 %v5157_v30  ;;  %v6103_v25 = vshrl.u32 %v822_v21, 7  ;;  %v820_v34 = vld [vmem:[%s7559_s2] sm:$0x3]  ;;  %s5819_s24 = smov 24   ;;  %s5821_s27 = smov 48   ;;  %vm2302_vm10 = vcmask 97280  }
  0x25   : > { %670 = vmatpush1.bf16.msra.mxu0 %v662_v36  ;;  %4413 = vmatprep.subr.msk.bf16.mxu1 %vm388_vm0, %v5160_v32  ;;  %s5822_s28 = smov 60   ;;  %s5823_s29 = smov 72   ;;  %vm2312_vm11 = vcmask 195584   ;;  %vm2322_vm12 = vcmask 293888   ;;  %vm2332_vm13 = vcmask 392192   ;;  %vm2342_vm14 = vcmask 490496  }
  0x26   : > { %763 = vmatprep.subr.bf16.mxu0 %v5164_v37  ;;  %v6106_v31 = vsub.s32 0, %v6103_v25  ;;  %v6112_v35 = vsub.s32 1, %v6103_v25  ;;  %s5824_s14 = smov 96   ;;  %s5825_s16 = smov 84   ;;  %vm2352_vm15 = vcmask 588800   ;;  %vm2372_vm3 = vcmask 785408  }
  0x27   : > { %s5826_s17 = smov 120   ;;  %s5827_s21 = smov 16   ;;  %vm2391_vm4 = vcmask 982016  }
  0x28   : > { %4426 = vmatmul.mubr.msk.bf16.gmra.mrb[4].mxu0 %vm381_vm1, %v535_v23  ;;  %478 = vmatpush1.bf16.msra.mxu1 %v470_v42  ;;  %s5828_s22 = smov 4  }
  0x29   : > { %699 = vmatprep.mubr.bf16.mxu0 %v5812_v2  ;;  %1137 = vmatprep.subr.bf16.mxu1 %v5171_v56 }
  0x2b   : > { %4408 = vmatmul.mubr.msk.bf16.gmra.mrb[4].mxu1 %vm381_vm1, %v362_v43  ;;  %v825_v43 = vrot.slane %v820_v34, %v6106_v31 }
  0x2c   : > { %507 = vmatprep.mubr.bf16.mxu1 %v5812_v2 }
  0x30   : > { %4436 = vmatmul.mubr.msk.bf16.vlgmr.msra.gmra.mrb[0].mxu0 %vm381_vm1, %v636_v49 }
  0x31   : > { %764 = vmatpush1.bf16.msra.mxu0 %v5162_v46  ;;  %709 = vmatprep.mubr.bf16.mxu0 %v5812_v2 }
  0x32   : > { %4446 = vmatprep.subr.msk.bf16.mxu0 %vm388_vm0, %v5166_v47 }
  0x33   : > { %4414 = vmatmul.mubr.msk.bf16.vlgmr.msra.gmra.mrb[0].mxu1 %vm381_vm1, %v5967_v15 }
  0x34   : > { %517 = vmatprep.mubr.bf16.mxu1 %v5812_v2  ;;  %1138 = vmatpush1.bf16.msra.mxu1 %v5169_v55 }
  0x35   : > { %766 = vmatpush1.bf16.msra.mxu0 %v758_v50  ;;  %1139 = vmatprep.subr.bf16.mxu1 %v5174_v57  ;;  %v5204_v50 = vld [vmem:[%s7560_s3 + $0x19c] ss:$8 sps:$4 sm:$0xff]  }
  0x38   : > { %4437 = vmatmul.mubr.msk.bf16.gmra.mrb[8].mxu0 %vm381_vm1, %v635_v45  ;;  %1140 = vmatpush1.bf16.msra.mxu1 %v5172_v58  ;;  %v829_v45 = vrot.slane %v820_v34, %v6112_v35 }
  0x39   : > { %795 = vmatprep.mubr.bf16.mxu0 %v5812_v2  ;;  %1141 = vmatprep.subr.bf16.mxu1 %v5177_v59 }
  0x3b   : > { %4415 = vmatmul.mubr.msk.bf16.gmra.mrb[8].mxu1 %vm381_vm1, %v340_v51 }
  0x3c   : > { %1142 = vmatpush1.bf16.msra.mxu1 %v5175_v60 }
  0x3d   : > { %1143 = vmatprep.subr.bf16.mxu1 %v5180_v61  ;;  %v5207_v61 = vld [vmem:[%s7560_s3 + $0x1ac] ss:$8 sps:$4 sm:$0xff]  }
  0x40   : > { %4447 = vmatmul.mubr.msk.bf16.vlgmr.msra.gmra.mrb[0].mxu0 %vm381_vm1, %v732_v54  ;;  %1144 = vmatpush1.bf16.msra.mxu1 %v5178_v62 }
  0x41   : > { %805 = vmatprep.mubr.bf16.mxu0 %v5812_v2  ;;  %1145 = vmatprep.subr.bf16.mxu1 %v5183_v63 }
  0x44   : > { %1146 = vmatpush1.bf16.msra.mxu1 %v5181_v0  ;;  %v5205_v0 = vld [vmem:[%s7560_s3 + $0x1a8] ss:$8 sps:$4 sm:$0xff]  }
  0x45   : > { %1147 = vmatprep.subr.bf16.mxu1 %v5186_v1 }
  0x48   : > { %4448 = vmatmul.mubr.msk.bf16.gmra.mrb[12].mxu0 %vm381_vm1, %v731_v53  ;;  %1148 = vmatpush1.bf16.msra.mxu1 %v5184_v3  ;;  %v5202_v53 = vld [vmem:[%s7560_s3 + $0x198] ss:$8 sps:$4 sm:$0xff]  }
  0x49   : > { %1149 = vmatprep.subr.bf16.mxu1 %v5189_v4 }
  0x4c   : > { %1150 = vmatpush1.bf16.msra.mxu1 %v5187_v5 }
  0x4d   : > { %1151 = vmatprep.subr.bf16.mxu1 %v5192_v6 }
  0x50   : > { %1152 = vmatpush1.bf16.msra.mxu1 %v5190_v7 }
  0x51   : > { %1153 = vmatprep.subr.bf16.mxu1 %v5195_v8  ;;  %v5210_v8 = vld [vmem:[%s7560_s3 + $0x1bc] ss:$8 sps:$4 sm:$0xff]  }
  0x54   : > { %1154 = vmatpush1.bf16.msra.mxu1 %v5193_v9 }
  0x55   : > { %1155 = vmatprep.subr.bf16.mxu1 %v5198_v10 }
  0x58   : > { %1156 = vmatpush1.bf16.msra.mxu1 %v5196_v11  ;;  %v5208_v11 = vld [vmem:[%s7560_s3 + $0x1b8] ss:$8 sps:$4 sm:$0xff]  }
  0x59   : > { %1157 = vmatprep.subr.bf16.mxu1 %v5201_v38 }
  0x5c   : > { %1158 = vmatpush1.bf16.msra.mxu1 %v5199_v41 }
  0x5d   : > { %1159 = vmatprep.subr.bf16.mxu1 %v5204_v50 }
  0x60   : > { %1160 = vmatpush1.bf16.msra.mxu1 %v5202_v53 }
  0x61   : > { %1161 = vmatprep.subr.bf16.mxu1 %v5207_v61 }
  0x64   : > { %1162 = vmatpush1.bf16.msra.mxu1 %v5205_v0 }
  0x65   : > { %1163 = vmatprep.subr.bf16.mxu1 %v5210_v8  ;;  %v5213_v8 = vld [vmem:[%s7560_s3] ss:$8 sps:$4 sm:$0xff]  }
  0x68   : > { %1164 = vmatpush1.bf16.msra.mxu1 %v5208_v11 }
  0xfb   : > { %v611_v12 = vpop.f32.mrb[4].mxu0 }
  0xfc   : > { %v613_v13 = vpop.f32.mrb[5].mxu0 }
  0xfd   : > { %v615_v14 = vpop.f32.mrb[6].mxu0 }
  0xfe   : > { %v616_v15 = vpop.f32.mrb[7].mxu0  ;;  %v439_v16 = vpop.f32.mrb[4].mxu1 }
  0xff   : > { %v441_v17 = vpop.f32.mrb[5].mxu1 }
 0x100   : > { %v443_v18 = vpop.f32.mrb[6].mxu1 }
 0x101   : > { %v444_v19 = vpop.f32.mrb[7].mxu1 }
 0x106   : > { %v509_v20 = vpop.f32.mrb[0].mxu1 }
 0x107   : > { %v511_v22 = vpop.f32.mrb[1].mxu1 }
 0x108   : > { %v513_v23 = vpop.f32.mrb[2].mxu1 }
 0x109   : > { %v515_v24 = vpop.f32.mrb[3].mxu1 }
 0x10b   : > { %v711_v26 = vpop.f32.mrb[8].mxu0 }
 0x10c   : > { %v713_v27 = vpop.f32.mrb[9].mxu0 }
 0x10d   : > { %v715_v28 = vpop.f32.mrb[10].mxu0 }
 0x10e   : > { %v716_v29 = vpop.f32.mrb[11].mxu0  ;;  %v519_v30 = vpop.f32.mrb[8].mxu1 }
 0x10f   : > { %v520_v32 = vadd.f32 %v519_v30, %v439_v16  ;;  %v521_v33 = vpop.f32.mrb[9].mxu1  ;;  %v4477_v16 = vld [vmem:[%s7560_s3 + $0x1c8] sm:$0x77] }
 0x110   : > { %v522_v36 = vadd.f32 %v521_v33, %v441_v17  ;;  %v523_v37 = vpop.f32.mrb[10].mxu1  ;;  %v4507_v18 = vcombine.high %v4477_v16, %v4477_v16  ;;  %v4506_v19 = vcombine.low %v4477_v16, %v4477_v16 }
 0x111   : > { %v622_v39 = vadd.f32 %v611_v12, %v520_v32  ;;  %v524_v40 = vpop.f32.mrb[11].mxu1 }
 0x112   : > { %v623_v42 = vadd.f32 %v613_v13, %v522_v36  ;;  %4508 = vmatprep.subr.msk.bf16.mxu1 %vm1130_vm5, %v4507_v18  ;;  %v1132_v21 = vsel %vm1130_vm5, %v4506_v19, 0 }
 0x113   : > { %v797_v44 = vpop.f32.mrb[0].mxu0  ;;  %v722_v46 = vadd.f32 %v711_v26, %v622_v39  ;;  %1166 = vmatpush1.bf16.msra.mxu1 %v1132_v21  ;;  %v5216_v21 = vld [vmem:[%s7560_s3 + $0x10] ss:$8 sps:$4 sm:$0xff]  }
 0x114   : > { %v4973_v47 = vadd.f32 %v797_v44, %v509_v20  ;;  %v799_v48 = vpop.f32.mrb[1].mxu0  ;;  %v723_v49 = vadd.f32 %v713_v27, %v623_v42 }
 0x115   : > { %v4974_v51 = vadd.f32 %v799_v48, %v511_v22  ;;  %v801_v52 = vpop.f32.mrb[2].mxu0 }
 0x116   : > { %v832_v54 = vadd.f32 %v4973_v47, %v825_v43  ;;  %v4975_v55 = vadd.f32 %v801_v52, %v513_v23  ;;  %v803_v56 = vpop.f32.mrb[3].mxu0  ;;  %v5215_v23 = vld [vmem:[%s7560_s3 + $0x4] ss:$8 sps:$4 sm:$0xff]  }
 0x117   : > { %v833_v57 = vadd.f32 %v4974_v51, %v829_v45  ;;  %v4976_v58 = vadd.f32 %v803_v56, %v515_v24  ;;  %1334 = vmatprep.subr.bf16.mxu1 %v5215_v23  ;;  %v5219_v23 = vld [vmem:[%s7560_s3 + $0x20] ss:$8 sps:$4 sm:$0xff]  }
 0x118   : > { %v838_v59 = vmax.f32 %v832_v54, 0.0  ;;  %v834_v60 = vadd.f32 %v4975_v55, %v825_v43 }
 0x119   : > { %v839_v62 = vmax.f32 %v833_v57, 0.0  ;;  %v835_v63 = vadd.f32 %v4976_v58, %v829_v45 }
 0x11a   : > { %v840_v1 = vmax.f32 %v834_v60, 0.0 }
 0x11b   : > { %v841_v3 = vmax.f32 %v835_v63, 0.0  ;;  %v807_v4 = vpop.f32.mrb[12].mxu0  ;;  %v5089_v5 = vpack.i.bf16 %v839_v62, %v838_v59 }
 0x11c   : > { %v818_v6 = vadd.f32 %v807_v4, %v722_v46  ;;  %v809_v7 = vpop.f32.mrb[13].mxu0 }
 0x11d   : > { %v819_v9 = vadd.f32 %v809_v7, %v723_v49  ;;  %v811_v10 = vpop.f32.mrb[14].mxu0  ;;  %5090 = vrot.lane.b32.xlu0 %v5089_v5, %s5813_s26  ;;  %v5094_v15 = vpack.i.bf16 %v841_v3, %v840_v1 }
 0x11e   : > { %v836_v12 = vadd.f32 %v825_v43, %v818_v6  ;;  %v812_v13 = vpop.f32.mrb[15].mxu0 }
 0x11f   : > { %v837_v14 = vadd.f32 %v829_v45, %v819_v9 }
 0x120   : > { %v842_v17 = vmax.f32 %v836_v12, 0.0 }
 0x121   : > { %v843_v20 = vmax.f32 %v837_v14, 0.0  ;;  %5095 = vrot.lane.b32.xlu0 %v5094_v15, %s5813_s26  ;;  %v5218_v14 = vld [vmem:[%s7560_s3 + $0x14] ss:$8 sps:$4 sm:$0xff]  }
 0x123   : > { %v5099_v22 = vpack.i.bf16 %v843_v20, %v842_v17 }
 0x125   : > { %5100 = vrot.lane.b32.xlu1 %v5099_v22, %s5813_s26  ;;  %v5221_v22 = vld [vmem:[%s7560_s3 + $0x24] ss:$8 sps:$4 sm:$0xff]   ;;  %s5820_s26 = smov 36  }
 0x18f   : > { %v5091_v24 = vpop.permute.xlu0 %5090 }
 0x190   : > { %v5093_v26 = vunpack.i.h.bf16 %v5091_v24  ;;  %v5092_v27 = vunpack.i.l.bf16 %v5091_v24  ;;  %v5224_v24 = vld [vmem:[%s7560_s3 + $0x34] ss:$8 sps:$4 sm:$0xff]  }
 0x192   : > { %v863_v29 = vsel %vm862_vm6, %v5092_v27, %v5093_v26  ;;  %v873_v33 = vmax.f32 %v839_v62, %v5093_v26  ;;  %v5222_v26 = vld [vmem:[%s7560_s3 + $0x30] ss:$8 sps:$4 sm:$0xff]   ;;  %v5227_v27 = vld [vmem:[%s7560_s3 + $0x44] ss:$8 sps:$4 sm:$0xff]  }
 0x193   : > { %v5096_v28 = vpop.permute.xlu0 %5095  ;;  %v872_v37 = vmax.f32 %v838_v59, %v863_v29  ;;  %v5230_v29 = vld [vmem:[%s7560_s3 + $0x54] ss:$8 sps:$4 sm:$0xff]  }
 0x194   : > { %v5098_v30 = vunpack.i.h.bf16 %v5096_v28  ;;  %v5097_v32 = vunpack.i.l.bf16 %v5096_v28  ;;  %v888_v44 = vrot.slane %v873_v33, 1  ;;  %v5225_v28 = vld [vmem:[%s7560_s3 + $0x40] ss:$8 sps:$4 sm:$0xff]  }
 0x195   : > { %v885_v47 = vrot.slane %v872_v37, 1 }
 0x196   : > { %v875_v34 = vmax.f32 %v841_v3, %v5098_v30  ;;  %v864_v36 = vsel %vm862_vm6, %v5097_v32, %v5098_v30  ;;  %v5228_v30 = vld [vmem:[%s7560_s3 + $0x50] ss:$8 sps:$4 sm:$0xff]   ;;  %v5233_v32 = vld [vmem:[%s7560_s3 + $0x64] ss:$8 sps:$4 sm:$0xff]  }
 0x197   : > { %v874_v38 = vmax.f32 %v840_v1, %v864_v36  ;;  %v5101_v39 = vpop.permute.xlu1 %5100  ;;  %v5234_v36 = vld [vmem:[%s7560_s3 + $0x70] ss:$8 sps:$4 sm:$0xff]  }
 0x198   : > { %v889_v40 = vrot.slane %v875_v34, 1  ;;  %v5103_v41 = vunpack.i.h.bf16 %v5101_v39  ;;  %v5102_v42 = vunpack.i.l.bf16 %v5101_v39  ;;  %v5242_v39 = vld [vmem:[%s7560_s3 + $0x94] ss:$8 sps:$4 sm:$0xff]  }
 0x199   : > { %v886_v43 = vrot.slane %v874_v38, 1 }
 0x19a   : > { %v877_v45 = vmax.f32 %v843_v20, %v5103_v41  ;;  %v865_v46 = vsel %vm862_vm6, %v5102_v42, %v5103_v41  ;;  %v890_v49 = vsel %vm533_vm2, %v888_v44, %v889_v40  ;;  %v5245_v41 = vld [vmem:[%s7560_s3 + $0xa4] ss:$8 sps:$4 sm:$0xff]   ;;  %v5243_v42 = vld [vmem:[%s7560_s3 + $0xa0] ss:$8 sps:$4 sm:$0xff]   ;;  %v5246_v44 = vld [vmem:[%s7560_s3 + $0xb0] ss:$8 sps:$4 sm:$0xff]  }
 0x19b   : > { %v876_v48 = vmax.f32 %v842_v17, %v865_v46  ;;  %v887_v51 = vsel %vm533_vm2, %v885_v47, %v886_v43  ;;  %v902_v55 = vmax.f32 %v873_v33, %v890_v49  ;;  %v5231_v33 = vld [vmem:[%s7560_s3 + $0x60] ss:$8 sps:$4 sm:$0xff]   ;;  %v5254_v47 = vld [vmem:[%s7560_s3 + $0xd4] ss:$8 sps:$4 sm:$0xff]   ;;  %v5252_v49 = vld [vmem:[%s7560_s3 + $0xd0] ss:$8 sps:$4 sm:$0xff]  }
 0x19c   : > { %v893_v50 = vrot.slane %v877_v45, 1  ;;  %v901_v59 = vmax.f32 %v872_v37, %v887_v51  ;;  %v5239_v37 = vld [vmem:[%s7560_s3 + $0x84] ss:$8 sps:$4 sm:$0xff]   ;;  %v5249_v46 = vld [vmem:[%s7560_s3 + $0xc0] ss:$8 sps:$4 sm:$0xff]   ;;  %vm2412_vm6 = vcmask 130048  }
 0x19d   : > { %v891_v52 = vrot.slane %v876_v48, 1 }
 0x19e   : > { %v894_v53 = vsel %vm533_vm2, %v889_v40, %v893_v50  ;;  %v6154_v54 = vmax.f32 %v877_v45, %v893_v50  ;;  %v5240_v40 = vld [vmem:[%s7560_s3 + $0x90] ss:$8 sps:$4 sm:$0xff]   ;;  %v5251_v45 = vld [vmem:[%s7560_s3 + $0xc4] ss:$8 sps:$4 sm:$0xff]  }
 0x19f   : > { %v6156_v56 = vmax.f32 %v875_v34, %v894_v53  ;;  %v892_v57 = vsel %vm533_vm2, %v886_v43, %v891_v52  ;;  %v6159_v58 = vmax.f32 %v876_v48, %v891_v52  ;;  %v5236_v34 = vld [vmem:[%s7560_s3 + $0x74] ss:$8 sps:$4 sm:$0xff]   ;;  %v935_v48 = vld [vmem:[%s7560_s3 + $0xe0] sm:$0x77] }
 0x1a0   : > { %v6163_v60 = vpack.c.bf16 %v6154_v54, %v6154_v54  ;;  %v6165_v61 = vmax.f32 %v874_v38, %v892_v57  ;;  %v5237_v38 = vld [vmem:[%s7560_s3 + $0x80] ss:$8 sps:$4 sm:$0xff]   ;;  %v5248_v43 = vld [vmem:[%s7560_s3 + $0xb4] ss:$8 sps:$4 sm:$0xff]   ;;  %v4539_v50 = vcombine.high %v935_v48, %v935_v48  ;;  %v4538_v51 = vcombine.low %v935_v48, %v935_v48 }
 0x1a1   : > { %v6168_v62 = vpack.c.bf16 %v6156_v56, %v902_v55  ;;  %v968_v63 = vpack.c.bf16 %v6159_v58, %v6159_v58  ;;  %v1885_v0 = vpack.c.bf16 %v6154_v54, %v6156_v56  ;;  %v5259_v53 = vld [vmem:[%s7560_s3 + $0x1d4] ss:$8 sps:$4 sm:$0xff]   ;;  %v5319_v48 = vld [vmem:[%s7560_s3 + $0x318] ss:$8 sps:$4 sm:$0xff]  }
 0x1a2   : > { %v6175_v1 = vpack.c.bf16 %v6165_v61, %v901_v59  ;;  %v978_v3 = vrot.slane %v6163_v60, 1  ;;  %v1650_v4 = vrot.slane %v6163_v60, 3  ;;  %v1884_v16 = vpack.c.bf16 %v6159_v58, %v6165_v61  ;;  %v5257_v59 = vld [vmem:[%s7560_s3 + $0x1d0] ss:$8 sps:$4 sm:$0xff]   ;;  %v5356_v54 = vld [vmem:[%s7560_s3 + $0x3d4] ss:$8 sps:$4 sm:$0xff]  }
 0x1a3   : > { %v977_v5 = vrot.slane %v6168_v62, 1  ;;  %v975_v6 = vrot.slane %v968_v63, 1  ;;  %v1408_v7 = vrot.slane %v968_v63, 2  ;;  %v1649_v11 = vrot.slane %v6168_v62, 3  ;;  %v5354_v56 = vld [vmem:[%s7560_s3 + $0x3d0] ss:$8 sps:$4 sm:$0xff]  }
 0x1a4   : > { %v974_v9 = vrot.slane %v6175_v1, 1  ;;  %v1407_v10 = vrot.slane %v6175_v1, 2  ;;  %v1646_v12 = vrot.slane %v6175_v1, 3  ;;  %v1647_v15 = vrot.slane %v968_v63, 3  ;;  %v5262_v63 = vld [vmem:[%s7560_s3 + $0x1e4] ss:$8 sps:$4 sm:$0xff]  }
 0x1a5   : > { %v979_v13 = vsel %vm533_vm2, %v977_v5, %v978_v3  ;;  %v6198_v19 = vsel %vm1645_vm8, %v1649_v11, %v1650_v4  ;;  %v1329_v52 = vsel %vm1130_vm5, %v4538_v51, 0  ;;  %v1410_v55 = vrot.slane %v6168_v62, 2  ;;  %v5263_v4 = vld [vmem:[%s7560_s3 + $0x1f0] ss:$8 sps:$4 sm:$0xff]   ;;  %v5266_v5 = vld [vmem:[%s7560_s3 + $0x200] ss:$8 sps:$4 sm:$0xff]  }
 0x1a6   : > { %4509 = vmatprep.mubr.msk.bf16.mxu1 %vm1126_vm7, %v979_v13  ;;  %v976_v17 = vsel %vm533_vm2, %v974_v9, %v975_v6  ;;  %v6196_v18 = vsel %vm388_vm0, %v1407_v10, %v1408_v7  ;;  %v6200_v20 = vsel %vm1645_vm8, %v1646_v12, %v1647_v15  ;;  %v1411_v57 = vrot.slane %v6163_v60, 2  ;;  %v5260_v60 = vld [vmem:[%s7560_s3 + $0x1e0] ss:$8 sps:$4 sm:$0xff]   ;;  %v5271_v6 = vld [vmem:[%s7560_s3 + $0x214] ss:$8 sps:$4 sm:$0xff]  }
 0x1a7   : > { %1170 = vmatmul.mubr.bf16.vlgmr.msra.gmra.mrb[12].mxu1 %v976_v17  ;;  %v5269_v7 = vld [vmem:[%s7560_s3 + $0x210] ss:$8 sps:$4 sm:$0xff]   ;;  %v5272_v9 = vld [vmem:[%s7560_s3 + $0x220] ss:$8 sps:$4 sm:$0xff]   ;;  %v5277_v10 = vld [vmem:[%s7560_s3 + $0x234] ss:$8 sps:$4 sm:$0xff]  }
 0x1a8   : > { %1335 = vmatpush1.bf16.msra.mxu1 %v5213_v8  ;;  %4541 = vmatprep.mubr.msk.bf16.mxu1 %vm1126_vm7, %v6168_v62  ;;  %v1412_v3 = vsel %vm388_vm0, %v1410_v55, %v1411_v57  ;;  %v5265_v62 = vld [vmem:[%s7560_s3 + $0x1f4] ss:$8 sps:$4 sm:$0xff]   ;;  %v5274_v8 = vld [vmem:[%s7560_s3 + $0x224] ss:$8 sps:$4 sm:$0xff]   ;;  %v5275_v11 = vld [vmem:[%s7560_s3 + $0x230] ss:$8 sps:$4 sm:$0xff]  }
 0x1a9   : > { %1336 = vmatprep.subr.bf16.mxu1 %v5218_v14  ;;  %v5280_v12 = vld [vmem:[%s7560_s3 + $0x244] ss:$8 sps:$4 sm:$0xff]   ;;  %v5278_v13 = vld [vmem:[%s7560_s3 + $0x240] ss:$8 sps:$4 sm:$0xff]   ;;  %v5283_v14 = vld [vmem:[%s7560_s3 + $0x254] ss:$8 sps:$4 sm:$0xff]  }
 0x1aa   : > { %v5281_v15 = vld [vmem:[%s7560_s3 + $0x250] ss:$8 sps:$4 sm:$0xff]   ;;  %v5286_v17 = vld [vmem:[%s7560_s3 + $0x264] ss:$8 sps:$4 sm:$0xff]   ;;  %vm2362_vm2 = vcmask 687104  }
 0x1ab   : > { %v5327_v51 = vld [vmem:[%s7560_s3 + $0x33c] ss:$8 sps:$4 sm:$0xff]   ;;  %v5328_v55 = vld [vmem:[%s7560_s3 + $0x348] ss:$8 sps:$4 sm:$0xff]  }
 0x1ac   : > { %1337 = vmatpush1.bf16.msra.mxu1 %v5216_v21  ;;  %v5284_v21 = vld [vmem:[%s7560_s3 + $0x260] ss:$8 sps:$4 sm:$0xff]   ;;  %v5333_v57 = vld [vmem:[%s7560_s3 + $0x35c] ss:$8 sps:$4 sm:$0xff]  }
 0x1ad   : > { %1338 = vmatprep.subr.bf16.mxu1 %v5221_v22  ;;  %v5289_v22 = vld [vmem:[%s7560_s3 + $0x274] ss:$8 sps:$4 sm:$0xff]  }
 0x1b0   : > { %1339 = vmatpush1.bf16.msra.mxu1 %v5219_v23  ;;  %v5287_v23 = vld [vmem:[%s7560_s3 + $0x270] ss:$8 sps:$4 sm:$0xff]  }
 0x1b1   : > { %1340 = vmatprep.subr.bf16.mxu1 %v5224_v24  ;;  %v5292_v24 = vld [vmem:[%s7560_s3 + $0x284] ss:$8 sps:$4 sm:$0xff]  }
 0x1b4   : > { %1341 = vmatpush1.bf16.msra.mxu1 %v5222_v26  ;;  %v5290_v26 = vld [vmem:[%s7560_s3 + $0x280] ss:$8 sps:$4 sm:$0xff]  }
 0x1b5   : > { %1342 = vmatprep.subr.bf16.mxu1 %v5227_v27  ;;  %v5295_v27 = vld [vmem:[%s7560_s3 + $0x294] ss:$8 sps:$4 sm:$0xff]  }
 0x1b8   : > { %1343 = vmatpush1.bf16.msra.mxu1 %v5225_v28  ;;  %v5293_v28 = vld [vmem:[%s7560_s3 + $0x290] ss:$8 sps:$4 sm:$0xff]  }
 0x1b9   : > { %1344 = vmatprep.subr.bf16.mxu1 %v5230_v29  ;;  %v5298_v29 = vld [vmem:[%s7560_s3 + $0x2a4] ss:$8 sps:$4 sm:$0xff]  }
 0x1bc   : > { %1345 = vmatpush1.bf16.msra.mxu1 %v5228_v30  ;;  %v4570_v30 = vld [vmem:[%s7560_s3 + $0x2b0] sm:$0x77] }
 0x1bd   : > { %1346 = vmatprep.subr.bf16.mxu1 %v5233_v32  ;;  %v5296_v32 = vld [vmem:[%s7560_s3 + $0x2a0] ss:$8 sps:$4 sm:$0xff]  }
 0x1c0   : > { %1347 = vmatpush1.bf16.msra.mxu1 %v5231_v33  ;;  %v4600_v33 = vcombine.high %v4570_v30, %v4570_v30 }
 0x1c1   : > { %1348 = vmatprep.subr.bf16.mxu1 %v5236_v34  ;;  %v4599_v34 = vcombine.low %v4570_v30, %v4570_v30  ;;  %v5377_v30 = vld [vmem:[%s7560_s3 + $0x444] ss:$8 sps:$4 sm:$0xff]  }
 0x1c4   : > { %1349 = vmatpush1.bf16.msra.mxu1 %v5234_v36  ;;  %v1563_v36 = vsel %vm1130_vm5, %v4599_v34, 0  ;;  %v5378_v34 = vld [vmem:[%s7560_s3 + $0x450] ss:$8 sps:$4 sm:$0xff]  }
 0x1c5   : > { %1350 = vmatprep.subr.bf16.mxu1 %v5239_v37  ;;  %v5303_v37 = vld [vmem:[%s7560_s3 + $0x2bc] ss:$8 sps:$4 sm:$0xff]  }
 0x1c8   : > { %1351 = vmatpush1.bf16.msra.mxu1 %v5237_v38  ;;  %v5301_v38 = vld [vmem:[%s7560_s3 + $0x2b8] ss:$8 sps:$4 sm:$0xff]  }
 0x1c9   : > { %1352 = vmatprep.subr.bf16.mxu1 %v5242_v39  ;;  %v5306_v39 = vld [vmem:[%s7560_s3 + $0x2cc] ss:$8 sps:$4 sm:$0xff]  }
 0x1cc   : > { %1353 = vmatpush1.bf16.msra.mxu1 %v5240_v40  ;;  %v5304_v40 = vld [vmem:[%s7560_s3 + $0x2c8] ss:$8 sps:$4 sm:$0xff]  }
 0x1cd   : > { %1354 = vmatprep.subr.bf16.mxu1 %v5245_v41  ;;  %v5309_v41 = vld [vmem:[%s7560_s3 + $0x2dc] ss:$8 sps:$4 sm:$0xff]  }
 0x1d0   : > { %1355 = vmatpush1.bf16.msra.mxu1 %v5243_v42  ;;  %v5307_v42 = vld [vmem:[%s7560_s3 + $0x2d8] ss:$8 sps:$4 sm:$0xff]  }
 0x1d1   : > { %1356 = vmatprep.subr.bf16.mxu1 %v5248_v43  ;;  %v5315_v43 = vld [vmem:[%s7560_s3 + $0x2fc] ss:$8 sps:$4 sm:$0xff]  }
 0x1d4   : > { %1357 = vmatpush1.bf16.msra.mxu1 %v5246_v44  ;;  %v5313_v44 = vld [vmem:[%s7560_s3 + $0x2f8] ss:$8 sps:$4 sm:$0xff]  }
 0x1d5   : > { %1358 = vmatprep.subr.bf16.mxu1 %v5251_v45  ;;  %v5318_v45 = vld [vmem:[%s7560_s3 + $0x30c] ss:$8 sps:$4 sm:$0xff]  }
 0x1d8   : > { %1359 = vmatpush1.bf16.msra.mxu1 %v5249_v46  ;;  %v5316_v46 = vld [vmem:[%s7560_s3 + $0x308] ss:$8 sps:$4 sm:$0xff]  }
 0x1d9   : > { %1360 = vmatprep.subr.bf16.mxu1 %v5254_v47  ;;  %v5321_v47 = vld [vmem:[%s7560_s3 + $0x31c] ss:$8 sps:$4 sm:$0xff]  }
 0x1dc   : > { %1361 = vmatpush1.bf16.msra.mxu1 %v5252_v49  ;;  %v5324_v49 = vld [vmem:[%s7560_s3 + $0x32c] ss:$8 sps:$4 sm:$0xff]  }
 0x1dd   : > { %4540 = vmatprep.subr.msk.bf16.mxu1 %vm1130_vm5, %v4539_v50  ;;  %v5322_v50 = vld [vmem:[%s7560_s3 + $0x328] ss:$8 sps:$4 sm:$0xff]  }
 0x1e0   : > { %1363 = vmatpush1.bf16.msra.mxu1 %v1329_v52  ;;  %v5325_v52 = vld [vmem:[%s7560_s3 + $0x338] ss:$8 sps:$4 sm:$0xff]  }
 0x1e1   : > { %1568 = vmatprep.subr.bf16.mxu1 %v5259_v53  ;;  %v5330_v53 = vld [vmem:[%s7560_s3 + $0x34c] ss:$8 sps:$4 sm:$0xff]  }
 0x1e3   : > { %1367 = vmatmul.mubr.bf16.vlgmr.msra.gmra.mrb[12].mxu1 %v6175_v1  ;;  %v5268_v1 = vld [vmem:[%s7560_s3 + $0x204] ss:$8 sps:$4 sm:$0xff]  }
 0x1e4   : > { %1569 = vmatpush1.bf16.msra.mxu1 %v5257_v59  ;;  %4602 = vmatprep.mubr.msk.bf16.mxu1 %vm1126_vm7, %v1412_v3  ;;  %v5331_v59 = vld [vmem:[%s7560_s3 + $0x358] ss:$8 sps:$4 sm:$0xff]   ;;  %v5334_v3 = vld [vmem:[%s7560_s3 + $0x368] ss:$8 sps:$4 sm:$0xff]  }
 0x1e5   : > { %1570 = vmatprep.subr.bf16.mxu1 %v5262_v63  ;;  %v5336_v63 = vld [vmem:[%s7560_s3 + $0x36c] ss:$8 sps:$4 sm:$0xff]  }
 0x1e8   : > { %1571 = vmatpush1.bf16.msra.mxu1 %v5260_v60  ;;  %v5339_v60 = vld [vmem:[%s7560_s3 + $0x37c] ss:$8 sps:$4 sm:$0xff]  }
 0x1e9   : > { %1572 = vmatprep.subr.bf16.mxu1 %v5265_v62  ;;  %v5337_v62 = vld [vmem:[%s7560_s3 + $0x378] ss:$8 sps:$4 sm:$0xff]  }
 0x1ec   : > { %1573 = vmatpush1.bf16.msra.mxu1 %v5263_v4  ;;  %v5342_v4 = vld [vmem:[%s7560_s3 + $0x38c] ss:$8 sps:$4 sm:$0xff]  }
 0x1ed   : > { %1574 = vmatprep.subr.bf16.mxu1 %v5268_v1  ;;  %v4631_v1 = vld [vmem:[%s7560_s3 + $0x398] sm:$0x77] }
 0x1f0   : > { %1575 = vmatpush1.bf16.msra.mxu1 %v5266_v5  ;;  %v5340_v5 = vld [vmem:[%s7560_s3 + $0x388] ss:$8 sps:$4 sm:$0xff]  }
 0x1f1   : > { %1576 = vmatprep.subr.bf16.mxu1 %v5271_v6  ;;  %v4661_v6 = vcombine.high %v4631_v1, %v4631_v1 }
 0x1f4   : > { %1577 = vmatpush1.bf16.msra.mxu1 %v5269_v7  ;;  %v4660_v7 = vcombine.low %v4631_v1, %v4631_v1  ;;  %v5403_v1 = vld [vmem:[%s7562_s5 + $0x24] ss:$8 sps:$4 sm:$0xff]  }
 0x1f5   : > { %1578 = vmatprep.subr.bf16.mxu1 %v5274_v8 }
 0x1f6   : > { %v1802_v8 = vsel %vm1130_vm5, %v4660_v7, 0  ;;  %v5404_v7 = vld [vmem:[%s7562_s5 + $0x120] ss:$8 sps:$4 sm:$0xff]  }
 0x1f8   : > { %1579 = vmatpush1.bf16.msra.mxu1 %v5272_v9  ;;  %v5347_v9 = vld [vmem:[%s7560_s3 + $0x3a4] ss:$8 sps:$4 sm:$0xff]  }
 0x1f9   : > { %1580 = vmatprep.subr.bf16.mxu1 %v5277_v10  ;;  %v5345_v10 = vld [vmem:[%s7560_s3 + $0x3a0] ss:$8 sps:$4 sm:$0xff]  }
 0x1fc   : > { %1581 = vmatpush1.bf16.msra.mxu1 %v5275_v11  ;;  %v5350_v11 = vld [vmem:[%s7560_s3 + $0x3b4] ss:$8 sps:$4 sm:$0xff]  }
 0x1fd   : > { %1582 = vmatprep.subr.bf16.mxu1 %v5280_v12  ;;  %v5348_v12 = vld [vmem:[%s7560_s3 + $0x3b0] ss:$8 sps:$4 sm:$0xff]  }
 0x200   : > { %1583 = vmatpush1.bf16.msra.mxu1 %v5278_v13  ;;  %v5353_v13 = vld [vmem:[%s7560_s3 + $0x3c4] ss:$8 sps:$4 sm:$0xff]  }
 0x201   : > { %1584 = vmatprep.subr.bf16.mxu1 %v5283_v14  ;;  %v5357_v14 = vld [vmem:[%s7560_s3 + $0x3e0] ss:$8 sps:$4 sm:$0xff]  }
 0x204   : > { %1585 = vmatpush1.bf16.msra.mxu1 %v5281_v15  ;;  %v5362_v15 = vld [vmem:[%s7560_s3 + $0x3f4] ss:$8 sps:$4 sm:$0xff]  }
 0x205   : > { %1586 = vmatprep.subr.bf16.mxu1 %v5286_v17  ;;  %v5360_v17 = vld [vmem:[%s7560_s3 + $0x3f0] ss:$8 sps:$4 sm:$0xff]  }
 0x208   : > { %1587 = vmatpush1.bf16.msra.mxu1 %v5284_v21  ;;  %v5365_v21 = vld [vmem:[%s7560_s3 + $0x404] ss:$8 sps:$4 sm:$0xff]  }
 0x209   : > { %1588 = vmatprep.subr.bf16.mxu1 %v5289_v22  ;;  %v5363_v22 = vld [vmem:[%s7560_s3 + $0x400] ss:$8 sps:$4 sm:$0xff]  }
 0x20c   : > { %1589 = vmatpush1.bf16.msra.mxu1 %v5287_v23  ;;  %v5368_v23 = vld [vmem:[%s7560_s3 + $0x414] ss:$8 sps:$4 sm:$0xff]  }
 0x20d   : > { %1590 = vmatprep.subr.bf16.mxu1 %v5292_v24  ;;  %v5366_v24 = vld [vmem:[%s7560_s3 + $0x410] ss:$8 sps:$4 sm:$0xff]  }
 0x210   : > { %1591 = vmatpush1.bf16.msra.mxu1 %v5290_v26  ;;  %v5371_v26 = vld [vmem:[%s7560_s3 + $0x424] ss:$8 sps:$4 sm:$0xff]  }
 0x211   : > { %1592 = vmatprep.subr.bf16.mxu1 %v5295_v27  ;;  %v5369_v27 = vld [vmem:[%s7560_s3 + $0x420] ss:$8 sps:$4 sm:$0xff]  }
 0x214   : > { %1593 = vmatpush1.bf16.msra.mxu1 %v5293_v28  ;;  %v5374_v28 = vld [vmem:[%s7560_s3 + $0x434] ss:$8 sps:$4 sm:$0xff]  }
 0x215   : > { %1594 = vmatprep.subr.bf16.mxu1 %v5298_v29  ;;  %v5372_v29 = vld [vmem:[%s7560_s3 + $0x430] ss:$8 sps:$4 sm:$0xff]  }
 0x218   : > { %1595 = vmatpush1.bf16.msra.mxu1 %v5296_v32  ;;  %v5375_v32 = vld [vmem:[%s7560_s3 + $0x440] ss:$8 sps:$4 sm:$0xff]  }
 0x219   : > { %4601 = vmatprep.subr.msk.bf16.mxu1 %vm1130_vm5, %v4600_v33  ;;  %v5380_v33 = vld [vmem:[%s7560_s3 + $0x454] ss:$8 sps:$4 sm:$0xff]  }
 0x21c   : > { %1597 = vmatpush1.bf16.msra.mxu1 %v1563_v36  ;;  %v5383_v36 = vld [vmem:[%s7560_s3 + $0x464] ss:$8 sps:$4 sm:$0xff]  }
 0x21d   : > { %1807 = vmatprep.subr.bf16.mxu1 %v5303_v37  ;;  %v5381_v37 = vld [vmem:[%s7560_s3 + $0x460] ss:$8 sps:$4 sm:$0xff]  }
 0x21f   : > { %1601 = vmatmul.mubr.bf16.vlgmr.msra.gmra.mrb[12].mxu1 %v6196_v18  ;;  %v5312_v18 = vld [vmem:[%s7560_s3 + $0x2ec] ss:$8 sps:$4 sm:$0xff]  }
 0x220   : > { %1808 = vmatpush1.bf16.msra.mxu1 %v5301_v38  ;;  %4663 = vmatprep.mubr.msk.bf16.mxu1 %vm1126_vm7, %v6198_v19  ;;  %v5310_v19 = vld [vmem:[%s7560_s3 + $0x2e8] ss:$8 sps:$4 sm:$0xff]   ;;  %v5386_v38 = vld [vmem:[%s7560_s3 + $0x474] ss:$8 sps:$4 sm:$0xff]  }
 0x221   : > { %1809 = vmatprep.subr.bf16.mxu1 %v5306_v39  ;;  %v4692_v39 = vld [vmem:[%s7560_s3 + $0x480] sm:$0x77] }
 0x224   : > { %1810 = vmatpush1.bf16.msra.mxu1 %v5304_v40  ;;  %v5384_v40 = vld [vmem:[%s7560_s3 + $0x470] ss:$8 sps:$4 sm:$0xff]  }
 0x225   : > { %1811 = vmatprep.subr.bf16.mxu1 %v5309_v41  ;;  %v4722_v41 = vcombine.high %v4692_v39, %v4692_v39 }
 0x228   : > { %1812 = vmatpush1.bf16.msra.mxu1 %v5307_v42  ;;  %v4721_v42 = vcombine.low %v4692_v39, %v4692_v39  ;;  %v5451_v39 = vld [vmem:[%s7562_s5 + $0xa4] ss:$8 sps:$4 sm:$0xff]  }
 0x229   : > { %1813 = vmatprep.subr.bf16.mxu1 %v5312_v18 }
 0x22a   : > { %v2035_v18 = vsel %vm1130_vm5, %v4721_v42, 0  ;;  %v5452_v42 = vld [vmem:[%s7562_s5 + $0x1a0] ss:$8 sps:$4 sm:$0xff]  }
 0x22c   : > { %1814 = vmatpush1.bf16.msra.mxu1 %v5310_v19  ;;  %v2087_v19 = vld [vmem:[%s7561_s4] sm:$0x3] }
 0x22d   : > { %1815 = vmatprep.subr.bf16.mxu1 %v5315_v43  ;;  %v2092_v43 = vrot.slane %v2087_v19, %v6106_v31 }
 0x230   : > { %1816 = vmatpush1.bf16.msra.mxu1 %v5313_v44  ;;  %v2096_v44 = vrot.slane %v2087_v19, %v6112_v35  ;;  %v5460_v19 = vld [vmem:[%s7562_s5 + $0x1b4] ss:$8 sps:$4 sm:$0xff]  }
 0x231   : > { %1817 = vmatprep.subr.bf16.mxu1 %v5318_v45 }
 0x234   : > { %1818 = vmatpush1.bf16.msra.mxu1 %v5316_v46 }
 0x235   : > { %1819 = vmatprep.subr.bf16.mxu1 %v5321_v47 }
 0x238   : > { %1820 = vmatpush1.bf16.msra.mxu1 %v5319_v48 }
 0x239   : > { %1821 = vmatprep.subr.bf16.mxu1 %v5324_v49 }
 0x23c   : > { %1822 = vmatpush1.bf16.msra.mxu1 %v5322_v50 }
 0x23d   : > { %1823 = vmatprep.subr.bf16.mxu1 %v5327_v51 }
 0x240   : > { %1824 = vmatpush1.bf16.msra.mxu1 %v5325_v52 }
 0x241   : > { %1825 = vmatprep.subr.bf16.mxu1 %v5330_v53 }
 0x244   : > { %1826 = vmatpush1.bf16.msra.mxu1 %v5328_v55  ;;  %v5389_v55 = vld [vmem:[%s7562_s5] ss:$8 sps:$4 sm:$0xff]  }
 0x245   : > { %1827 = vmatprep.subr.bf16.mxu1 %v5333_v57  ;;  %v5391_v57 = vld [vmem:[%s7562_s5 + $0x4] ss:$8 sps:$4 sm:$0xff]  }
 0x248   : > { %1828 = vmatpush1.bf16.msra.mxu1 %v5331_v59  ;;  %v5392_v59 = vld [vmem:[%s7562_s5 + $0x100] ss:$8 sps:$4 sm:$0xff]  }
 0x249   : > { %1829 = vmatprep.subr.bf16.mxu1 %v5336_v63  ;;  %v5394_v63 = vld [vmem:[%s7562_s5 + $0x104] ss:$8 sps:$4 sm:$0xff]  }
 0x24a   : > { %3871 = vmatprep.subr.bf16.mxu0 %v5394_v63  ;;  %v5470_v63 = vld [vmem:[%s7562_s5 + $0x1d0] ss:$8 sps:$4 sm:$0xff]  }
 0x24b   : > { %3872 = vmatpush1.bf16.msra.mxu0 %v5392_v59  ;;  %v5467_v59 = vld [vmem:[%s7562_s5 + $0xd0] ss:$8 sps:$4 sm:$0xff]  }
 0x24c   : > { %1830 = vmatpush1.bf16.msra.mxu1 %v5334_v3  ;;  %v5397_v3 = vld [vmem:[%s7562_s5 + $0x14] ss:$8 sps:$4 sm:$0xff]  }
 0x24d   : > { %1831 = vmatprep.subr.bf16.mxu1 %v5339_v60  ;;  %v5400_v60 = vld [vmem:[%s7562_s5 + $0x114] ss:$8 sps:$4 sm:$0xff]  }
 0x24e   : > { %3873 = vmatprep.subr.bf16.mxu0 %v5400_v60  ;;  %v5478_v60 = vld [vmem:[%s7562_s5 + $0x1e4] ss:$8 sps:$4 sm:$0xff]  }
 0x250   : > { %1832 = vmatpush1.bf16.msra.mxu1 %v5337_v62  ;;  %v5395_v62 = vld [vmem:[%s7562_s5 + $0x10] ss:$8 sps:$4 sm:$0xff]  }
 0x251   : > { %1833 = vmatprep.subr.bf16.mxu1 %v5342_v4  ;;  %v5398_v4 = vld [vmem:[%s7562_s5 + $0x110] ss:$8 sps:$4 sm:$0xff]  }
 0x252   : > { %3874 = vmatpush1.bf16.msra.mxu0 %v5398_v4  ;;  %v5476_v4 = vld [vmem:[%s7562_s5 + $0x1e0] ss:$8 sps:$4 sm:$0xff]  }
 0x254   : > { %1834 = vmatpush1.bf16.msra.mxu1 %v5340_v5  ;;  %v5406_v5 = vld [vmem:[%s7562_s5 + $0x124] ss:$8 sps:$4 sm:$0xff]  }
 0x255   : > { %4662 = vmatprep.subr.msk.bf16.mxu1 %vm1130_vm5, %v4661_v6  ;;  %v5401_v6 = vld [vmem:[%s7562_s5 + $0x20] ss:$8 sps:$4 sm:$0xff]   ;;  %3875 = vmatprep.subr.bf16.mxu0 %v5406_v5 }
 0x256   : > { %3876 = vmatpush1.bf16.msra.mxu0 %v5404_v7 }
 0x258   : > { %1836 = vmatpush1.bf16.msra.mxu1 %v1802_v8  ;;  %v5409_v8 = vld [vmem:[%s7562_s5 + $0x34] ss:$8 sps:$4 sm:$0xff]  }
 0x259   : > { %2040 = vmatprep.subr.bf16.mxu1 %v5347_v9  ;;  %v5412_v9 = vld [vmem:[%s7562_s5 + $0x134] ss:$8 sps:$4 sm:$0xff]  }
 0x25a   : > { %3877 = vmatprep.subr.bf16.mxu0 %v5412_v9  ;;  %v5816_v9 = vmov 1934713408  }
 0x25b   : > { %1840 = vmatmul.mubr.bf16.vlgmr.msra.gmra.mrb[12].mxu1 %v6200_v20  ;;  %v5351_v20 = vld [vmem:[%s7560_s3 + $0x3c0] ss:$8 sps:$4 sm:$0xff]  }
 0x25c   : > { %2041 = vmatpush1.bf16.msra.mxu1 %v5345_v10  ;;  %4724 = vmatprep.mubr.msk.bf16.mxu1 %vm1126_vm7, %v1885_v0  ;;  %v5359_v0 = vld [vmem:[%s7560_s3 + $0x3e4] ss:$8 sps:$4 sm:$0xff]   ;;  %v5407_v10 = vld [vmem:[%s7562_s5 + $0x30] ss:$8 sps:$4 sm:$0xff]   ;;  %vm4266_vm7 = vcmask 1043456  }
 0x25d   : > { %2042 = vmatprep.subr.bf16.mxu1 %v5350_v11  ;;  %v5410_v11 = vld [vmem:[%s7562_s5 + $0x130] ss:$8 sps:$4 sm:$0xff]  }
 0x25e   : > { %3878 = vmatpush1.bf16.msra.mxu0 %v5410_v11 }
 0x260   : > { %2043 = vmatpush1.bf16.msra.mxu1 %v5348_v12  ;;  %v5415_v12 = vld [vmem:[%s7562_s5 + $0x44] ss:$8 sps:$4 sm:$0xff]  }
 0x261   : > { %2044 = vmatprep.subr.bf16.mxu1 %v5353_v13  ;;  %v5418_v13 = vld [vmem:[%s7562_s5 + $0x144] ss:$8 sps:$4 sm:$0xff]  }
 0x262   : > { %3879 = vmatprep.subr.bf16.mxu0 %v5418_v13 }
 0x264   : > { %2045 = vmatpush1.bf16.msra.mxu1 %v5351_v20  ;;  %v5413_v20 = vld [vmem:[%s7562_s5 + $0x40] ss:$8 sps:$4 sm:$0xff]  }
 0x265   : > { %2046 = vmatprep.subr.bf16.mxu1 %v5356_v54  ;;  %v5416_v54 = vld [vmem:[%s7562_s5 + $0x140] ss:$8 sps:$4 sm:$0xff]  }
 0x266   : > { %3880 = vmatpush1.bf16.msra.mxu0 %v5416_v54 }
 0x268   : > { %2047 = vmatpush1.bf16.msra.mxu1 %v5354_v56  ;;  %v5421_v56 = vld [vmem:[%s7562_s5 + $0x54] ss:$8 sps:$4 sm:$0xff]  }
 0x269   : > { %2048 = vmatprep.subr.bf16.mxu1 %v5359_v0  ;;  %v5424_v0 = vld [vmem:[%s7562_s5 + $0x154] ss:$8 sps:$4 sm:$0xff]  }
 0x26a   : > { %3881 = vmatprep.subr.bf16.mxu0 %v5424_v0 }
 0x26c   : > { %2049 = vmatpush1.bf16.msra.mxu1 %v5357_v14  ;;  %v5419_v14 = vld [vmem:[%s7562_s5 + $0x50] ss:$8 sps:$4 sm:$0xff]  }
 0x26d   : > { %2050 = vmatprep.subr.bf16.mxu1 %v5362_v15  ;;  %v5422_v15 = vld [vmem:[%s7562_s5 + $0x150] ss:$8 sps:$4 sm:$0xff]  }
 0x26e   : > { %3882 = vmatpush1.bf16.msra.mxu0 %v5422_v15 }
 0x270   : > { %2051 = vmatpush1.bf16.msra.mxu1 %v5360_v17  ;;  %v5427_v17 = vld [vmem:[%s7562_s5 + $0x64] ss:$8 sps:$4 sm:$0xff]  }
 0x271   : > { %2052 = vmatprep.subr.bf16.mxu1 %v5365_v21  ;;  %v5430_v21 = vld [vmem:[%s7562_s5 + $0x164] ss:$8 sps:$4 sm:$0xff]  }
 0x272   : > { %3883 = vmatprep.subr.bf16.mxu0 %v5430_v21 }
 0x274   : > { %2053 = vmatpush1.bf16.msra.mxu1 %v5363_v22  ;;  %v5425_v22 = vld [vmem:[%s7562_s5 + $0x60] ss:$8 sps:$4 sm:$0xff]  }
 0x275   : > { %2054 = vmatprep.subr.bf16.mxu1 %v5368_v23  ;;  %v5428_v23 = vld [vmem:[%s7562_s5 + $0x160] ss:$8 sps:$4 sm:$0xff]  }
 0x276   : > { %3884 = vmatpush1.bf16.msra.mxu0 %v5428_v23 }
 0x278   : > { %2055 = vmatpush1.bf16.msra.mxu1 %v5366_v24  ;;  %v5433_v24 = vld [vmem:[%s7562_s5 + $0x74] ss:$8 sps:$4 sm:$0xff]  }
 0x279   : > { %2056 = vmatprep.subr.bf16.mxu1 %v5371_v26  ;;  %v5436_v26 = vld [vmem:[%s7562_s5 + $0x174] ss:$8 sps:$4 sm:$0xff]  }
 0x27a   : > { %3885 = vmatprep.subr.bf16.mxu0 %v5436_v26  ;;  %v5817_v26 = vmov 0.0  }
 0x27c   : > { %2057 = vmatpush1.bf16.msra.mxu1 %v5369_v27  ;;  %v5431_v27 = vld [vmem:[%s7562_s5 + $0x70] ss:$8 sps:$4 sm:$0xff]  }
 0x27d   : > { %2058 = vmatprep.subr.bf16.mxu1 %v5374_v28  ;;  %v5434_v28 = vld [vmem:[%s7562_s5 + $0x170] ss:$8 sps:$4 sm:$0xff]  }
 0x27e   : > { %3886 = vmatpush1.bf16.msra.mxu0 %v5434_v28 }
 0x280   : > { %2059 = vmatpush1.bf16.msra.mxu1 %v5372_v29  ;;  %v5439_v29 = vld [vmem:[%s7562_s5 + $0x84] ss:$8 sps:$4 sm:$0xff]  }
 0x281   : > { %2060 = vmatprep.subr.bf16.mxu1 %v5377_v30  ;;  %v5442_v30 = vld [vmem:[%s7562_s5 + $0x184] ss:$8 sps:$4 sm:$0xff]  }
 0x282   : > { %3887 = vmatprep.subr.bf16.mxu0 %v5442_v30  ;;  %v5484_v30 = vld [vmem:[%s7562_s5 + $0x1f4] ss:$8 sps:$4 sm:$0xff]  }
 0x284   : > { %2061 = vmatpush1.bf16.msra.mxu1 %v5375_v32  ;;  %v5437_v32 = vld [vmem:[%s7562_s5 + $0x80] ss:$8 sps:$4 sm:$0xff]  }
 0x285   : > { %2062 = vmatprep.subr.bf16.mxu1 %v5380_v33  ;;  %v5440_v33 = vld [vmem:[%s7562_s5 + $0x180] ss:$8 sps:$4 sm:$0xff]  }
 0x286   : > { %3888 = vmatpush1.bf16.msra.mxu0 %v5440_v33 }
 0x288   : > { %2063 = vmatpush1.bf16.msra.mxu1 %v5378_v34  ;;  %v5445_v34 = vld [vmem:[%s7562_s5 + $0x94] ss:$8 sps:$4 sm:$0xff]  }
 0x289   : > { %2064 = vmatprep.subr.bf16.mxu1 %v5383_v36  ;;  %v5448_v36 = vld [vmem:[%s7562_s5 + $0x194] ss:$8 sps:$4 sm:$0xff]  }
 0x28a   : > { %3889 = vmatprep.subr.bf16.mxu0 %v5448_v36 }
 0x28c   : > { %2065 = vmatpush1.bf16.msra.mxu1 %v5381_v37  ;;  %v5443_v37 = vld [vmem:[%s7562_s5 + $0x90] ss:$8 sps:$4 sm:$0xff]  }
 0x28d   : > { %2066 = vmatprep.subr.bf16.mxu1 %v5386_v38  ;;  %v5446_v38 = vld [vmem:[%s7562_s5 + $0x190] ss:$8 sps:$4 sm:$0xff]  }
 0x28e   : > { %3890 = vmatpush1.bf16.msra.mxu0 %v5446_v38 }
 0x290   : > { %2067 = vmatpush1.bf16.msra.mxu1 %v5384_v40  ;;  %v5454_v40 = vld [vmem:[%s7562_s5 + $0x1a4] ss:$8 sps:$4 sm:$0xff]  }
 0x291   : > { %4723 = vmatprep.subr.msk.bf16.mxu1 %vm1130_vm5, %v4722_v41  ;;  %v5449_v41 = vld [vmem:[%s7562_s5 + $0xa0] ss:$8 sps:$4 sm:$0xff]   ;;  %3891 = vmatprep.subr.bf16.mxu0 %v5454_v40  ;;  %vm2402_vm5 = vcmask 31744  }
 0x292   : > { %3892 = vmatpush1.bf16.msra.mxu0 %v5452_v42 }
 0x293   : > { %3893 = vmatprep.subr.bf16.mxu0 %v5460_v19 }
 0x294   : > { %2069 = vmatpush1.bf16.msra.mxu1 %v2035_v18  ;;  %v5457_v18 = vld [vmem:[%s7562_s5 + $0xb4] ss:$8 sps:$4 sm:$0xff]  }
 0x295   : > { %3830 = vmatprep.subr.bf16.mxu1 %v5391_v57  ;;  %v5472_v57 = vld [vmem:[%s7562_s5 + $0x1d4] ss:$8 sps:$4 sm:$0xff]  }
 0x297   : > { %2073 = vmatmul.mubr.bf16.vlgmr.msra.gmra.mrb[12].mxu1 %v1884_v16 }
 0x298   : > { %3831 = vmatpush1.bf16.msra.mxu1 %v5389_v55  ;;  %v5469_v55 = vld [vmem:[%s7562_s5 + $0xd4] ss:$8 sps:$4 sm:$0xff]  }
 0x299   : > { %3832 = vmatprep.subr.bf16.mxu1 %v5397_v3  ;;  %v5475_v3 = vld [vmem:[%s7562_s5 + $0xe4] ss:$8 sps:$4 sm:$0xff]  }
 0x29c   : > { %3833 = vmatpush1.bf16.msra.mxu1 %v5395_v62  ;;  %v5473_v62 = vld [vmem:[%s7562_s5 + $0xe0] ss:$8 sps:$4 sm:$0xff]  }
 0x29d   : > { %3834 = vmatprep.subr.bf16.mxu1 %v5403_v1 }
 0x2a0   : > { %3835 = vmatpush1.bf16.msra.mxu1 %v5401_v6  ;;  %v5815_v6 = vmov 1983009808  }
 0x2a1   : > { %3836 = vmatprep.subr.bf16.mxu1 %v5409_v8  ;;  %v2150_v7 = vunpack.c.l.s4 %v5815_v6 }
 0x2a4   : > { %3837 = vmatpush1.bf16.msra.mxu1 %v5407_v10  ;;  %v2165_v10 = vunpack.c.l.s4 %v5816_v9 }
 0x2a5   : > { %3838 = vmatprep.subr.bf16.mxu1 %v5415_v12 }
 0x2a8   : > { %3839 = vmatpush1.bf16.msra.mxu1 %v5413_v20  ;;  %v2151_v20 = vunpack.c.0.s8 %v2150_v7 }
 0x2a9   : > { %3840 = vmatprep.subr.bf16.mxu1 %v5421_v56 }
 0x2ac   : > { %3841 = vmatpush1.bf16.msra.mxu1 %v5419_v14  ;;  %v2166_v14 = vunpack.c.0.s8 %v2165_v10 }
 0x2ad   : > { %3842 = vmatprep.subr.bf16.mxu1 %v5427_v17 }
 0x2b0   : > { %3843 = vmatpush1.bf16.msra.mxu1 %v5425_v22 }
 0x2b1   : > { %3844 = vmatprep.subr.bf16.mxu1 %v5433_v24 }
 0x2b4   : > { %3845 = vmatpush1.bf16.msra.mxu1 %v5431_v27  ;;  %v5481_v27 = vld [vmem:[%s7562_s5 + $0xf4] ss:$8 sps:$4 sm:$0xff]  }
 0x2b5   : > { %3846 = vmatprep.subr.bf16.mxu1 %v5439_v29  ;;  %v5482_v29 = vld [vmem:[%s7562_s5 + $0x1f0] ss:$8 sps:$4 sm:$0xff]  }
 0x2b8   : > { %3847 = vmatpush1.bf16.msra.mxu1 %v5437_v32 }
 0x2b9   : > { %3848 = vmatprep.subr.bf16.mxu1 %v5445_v34 }
 0x2bc   : > { %3849 = vmatpush1.bf16.msra.mxu1 %v5443_v37 }
 0x2bd   : > { %3850 = vmatprep.subr.bf16.mxu1 %v5451_v39  ;;  %v5487_v39 = vld [vmem:[%s7562_s5 + $0x204] ss:$8 sps:$4 sm:$0xff]  }
 0x2c0   : > { %3851 = vmatpush1.bf16.msra.mxu1 %v5449_v41 }
 0x2c1   : > { %3852 = vmatprep.subr.bf16.mxu1 %v5457_v18 }
 0x36a   : > { %v2074_v45 = vpop.f32.mrb[12].mxu1 }
 0x36b   : > { %v6572_v46 = vadd.f32 %v2092_v43, %v2074_v45  ;;  %v2076_v47 = vpop.f32.mrb[13].mxu1  ;;  %v5463_v45 = vld [vmem:[%s7562_s5 + $0xc4] ss:$8 sps:$4 sm:$0xff]  }
 0x36c   : > { %v6574_v48 = vadd.f32 %v2096_v44, %v2076_v47  ;;  %v2078_v49 = vpop.f32.mrb[14].mxu1  ;;  %v5466_v47 = vld [vmem:[%s7562_s5 + $0x1c4] ss:$8 sps:$4 sm:$0xff]  }
 0x36d   : > { %v2103_v50 = vmax.f32 %v6572_v46, 0.0  ;;  %v6577_v51 = vadd.f32 %v2092_v43, %v2078_v49  ;;  %v2080_v58 = vpop.f32.mrb[15].mxu1  ;;  %v5455_v43 = vld [vmem:[%s7562_s5 + $0xb0] ss:$8 sps:$4 sm:$0xff]   ;;  %v5461_v49 = vld [vmem:[%s7562_s5 + $0xc0] ss:$8 sps:$4 sm:$0xff]  }
 0x36e   : > { %v2104_v61 = vmax.f32 %v6574_v48, 0.0  ;;  %v6580_v16 = vadd.f32 %v2096_v44, %v2080_v58  ;;  %v5458_v44 = vld [vmem:[%s7562_s5 + $0x1b0] ss:$8 sps:$4 sm:$0xff]   ;;  %3853 = vmatpush1.bf16.msra.mxu1 %v5455_v43  ;;  %v5464_v58 = vld [vmem:[%s7562_s5 + $0x1c0] ss:$8 sps:$4 sm:$0xff]   ;;  %v2154_v48 = vsub.s32 %v2151_v20, %v6103_v25 }
 0x36f   : > { %2111 = vrot.lane.b32.xlu1 %v2103_v50, %s5814_s25  ;;  %v2105_v52 = vmax.f32 %v6577_v51, 0.0  ;;  %3894 = vmatpush1.bf16.msra.mxu0 %v5458_v44 }
 0x370   : > { %2113 = vrot.lane.b32.xlu0 %v2104_v61, %s5814_s25  ;;  %v2106_v53 = vmax.f32 %v6580_v16, 0.0  ;;  %3854 = vmatprep.subr.bf16.mxu1 %v5463_v45 }
 0x371   : > { %3895 = vmatprep.subr.bf16.mxu0 %v5466_v47 }
 0x372   : > { %3855 = vmatpush1.bf16.msra.mxu1 %v5461_v49 }
 0x373   : > { %2115 = vrot.lane.b32.xlu1 %v2105_v52, %s5814_s25  ;;  %3896 = vmatpush1.bf16.msra.mxu0 %v5464_v58 }
 0x374   : > { %2117 = vrot.lane.b32.xlu0 %v2106_v53, %s5814_s25  ;;  %3856 = vmatprep.subr.bf16.mxu1 %v5469_v55 }
 0x375   : > { %3897 = vmatprep.subr.bf16.mxu0 %v5472_v57 }
 0x376   : > { %3857 = vmatpush1.bf16.msra.mxu1 %v5467_v59 }
 0x377   : > { %3898 = vmatpush1.bf16.msra.mxu0 %v5470_v63  ;;  %3858 = vmatprep.subr.bf16.mxu1 %v5475_v3 }
 0x378   : > { %3899 = vmatprep.subr.bf16.mxu0 %v5478_v60 }
 0x37a   : > { %3859 = vmatpush1.bf16.msra.mxu1 %v5473_v62 }
 0x37b   : > { %3900 = vmatpush1.bf16.msra.mxu0 %v5476_v4  ;;  %3860 = vmatprep.subr.bf16.mxu1 %v5481_v27 }
 0x37c   : > { %3901 = vmatprep.subr.bf16.mxu0 %v5484_v30 }
 0x37f   : > { %3902 = vmatpush1.bf16.msra.mxu0 %v5482_v29 }
 0x380   : > { %3912 = vmatprep.subr.bf16.mxu0 %v5487_v39 }
 0x3e1   : > { %v2112_v1 = vpop.permute.xlu1 %2111 }
 0x3e2   : > { %v2114_v5 = vpop.permute.xlu0 %2113 }
 0x3e3   : > { %v2120_v8 = vsel %vm2119_vm9, %v2112_v1, %v2114_v5  ;;  %v2127_v11 = vmax.f32 %v2104_v61, %v2114_v5 }
 0x3e4   : > { %v2126_v13 = vmax.f32 %v2103_v50, %v2120_v8  ;;  %v6789_v50 = vsub.s32 %v2166_v14, %v6103_v25 }
 0x3e5   : > { %v2116_v12 = vpop.permute.xlu1 %2115  ;;  %v2137_v17 = vrot.slane %v2127_v11, 2 }
 0x3e6   : > { %v2118_v54 = vpop.permute.xlu0 %2117  ;;  %v2134_v22 = vrot.slane %v2126_v13, 2 }
 0x3e7   : > { %v2121_v56 = vsel %vm2119_vm9, %v2116_v12, %v2118_v54  ;;  %v2129_v0 = vmax.f32 %v2106_v53, %v2118_v54 }
 0x3e8   : > { %v2128_v15 = vmax.f32 %v2105_v52, %v2121_v56  ;;  %v5479_v52 = vld [vmem:[%s7562_s5 + $0xf0] ss:$8 sps:$4 sm:$0xff]  }
 0x3e9   : > { %v2138_v21 = vrot.slane %v2129_v0, 2  ;;  %3861 = vmatpush1.bf16.msra.mxu1 %v5479_v52 }
 0x3ea   : > { %v2135_v61 = vrot.slane %v2128_v15, 2  ;;  %4270 = vmatprep.subr.bf16.mxu1 %v5812_v2 }
 0x3eb   : > { %v2139_v46 = vsel %vm388_vm0, %v2137_v17, %v2138_v21  ;;  %v2147_v49 = vmax.f32 %v2129_v0, %v2138_v21 }
 0x3ec   : > { %v2136_v23 = vsel %vm388_vm0, %v2134_v22, %v2135_v61  ;;  %v2145_v24 = vmax.f32 %v2127_v11, %v2139_v46  ;;  %v2146_v47 = vmax.f32 %v2128_v15, %v2135_v61 }
 0x3ed   : > { %v2144_v16 = vmax.f32 %v2126_v13, %v2136_v23  ;;  %v2277_v3 = vrot.slane %v2147_v49, %v2154_v48 }
 0x3ee   : > { %v2229_v53 = vrot.slane %v2145_v24, %v2154_v48  ;;  %v2222_v51 = vcombine.high %v2145_v24, %v5817_v26  ;;  %v2203_v63 = vrot.slane %v2146_v47, %v2154_v48  ;;  %v2221_v21 = vcombine.high %v2146_v47, %v5817_v26 }
 0x3ef   : > { %v2155_v28 = vrot.slane %v2144_v16, %v2154_v48  ;;  %v2148_v25 = vcombine.high %v2144_v16, %v5817_v26  ;;  %v2285_v8 = vrot.slane %v2277_v3, %v6789_v50  ;;  %v2278_v9 = vcombine.high %v2277_v3, %v5817_v26 }
 0x3f0   : > { %v6807_v32 = vrot.slane %v2229_v53, %v6789_v50  ;;  %v2237_v33 = vcombine.high %v2229_v53, %v5817_v26  ;;  %v2236_v38 = vrot.slane %v2222_v51, %v2154_v48  ;;  %v2211_v7 = vrot.slane %v2203_v63, %v6789_v50 }
 0x3f1   : > { %v6811_v34 = vrot.slane %v2155_v28, %v6789_v50  ;;  %v2163_v36 = vcombine.high %v2155_v28, %v5817_v26  ;;  %v2162_v37 = vrot.slane %v2148_v25, %v2154_v48  ;;  %v2204_v12 = vcombine.high %v2203_v63, %v5817_v26 }
 0x3f2   : > { %v2267_v40 = vcombine.high %v6807_v32, %v5817_v26  ;;  %v2251_v41 = vrot.slane %v2237_v33, %v6789_v50  ;;  %v2259_v45 = vrot.slane %v2236_v38, %v6789_v50  ;;  %v2252_v59 = vcombine.high %v2236_v38, %v5817_v26 }
 0x3f3   : > { %v2193_v42 = vcombine.high %v6811_v34, %v5817_v26  ;;  %v2177_v18 = vrot.slane %v2163_v36, %v6789_v50  ;;  %v2185_v44 = vrot.slane %v2162_v37, %v6789_v50  ;;  %v2178_v57 = vcombine.high %v2162_v37, %v5817_v26 }
 0x3f4   : > { %v2268_v60 = vcombine.high %v2251_v41, %v5817_v26  ;;  %v2266_v1 = vrot.slane %v2252_v59, %v6789_v50  ;;  %v2269_v5 = vcombine.high %v2259_v45, %v5817_v26  ;;  %v5124_v10 = vpack.i.bf16 %v2285_v8, %v2211_v7  ;;  %v5496_v59 = vld [vmem:[%s7562_s5 + $0x234] ss:$8 sps:$4 sm:$0xff]  }
 0x3f5   : > { %v5109_v19 = vpack.i.bf16 %v2267_v40, %v2193_v42  ;;  %v5104_v43 = vpack.i.bf16 %v2251_v41, %v2177_v18  ;;  %v2194_v58 = vcombine.high %v2177_v18, %v5817_v26  ;;  %v5114_v55 = vpack.i.bf16 %v2259_v45, %v2185_v44  ;;  %v5490_v40 = vld [vmem:[%s7562_s5 + $0x214] ss:$8 sps:$4 sm:$0xff]  }
 0x3f6   : > { %v2195_v62 = vcombine.high %v2185_v44, %v5817_v26  ;;  %v2192_v4 = vrot.slane %v2178_v57, %v6789_v50  ;;  %v2219_v13 = vcombine.high %v2211_v7, %v5817_v26  ;;  %v2270_v20 = vcombine.high %v2266_v1, %v5817_v26  ;;  %v5493_v44 = vld [vmem:[%s7562_s5 + $0x224] ss:$8 sps:$4 sm:$0xff]  }
 0x3f7   : > { %5110 = vrot.lane.b32.xlu0 %v5109_v19, %s5818_s23  ;;  %5105 = vrot.lane.b32.xlu1 %v5104_v43, %s5819_s24  ;;  %v2218_v54 = vrot.slane %v2204_v12, %v6789_v50  ;;  %v2292_v56 = vrot.slane %v2278_v9, %v6789_v50  ;;  %v2293_v14 = vcombine.high %v2285_v8, %v5817_v26  ;;  %v5488_v43 = vld [vmem:[%s7562_s5 + $0x210] ss:$8 sps:$4 sm:$0xff]   ;;  %v5497_v8 = vld [vmem:[%s7562_s5 + $0x240] ss:$8 sps:$4 sm:$0xff]  }
 0x3f8   : > { %v5119_v6 = vpack.i.bf16 %v2266_v1, %v2192_v4  ;;  %v2196_v11 = vcombine.high %v2192_v4, %v5817_v26  ;;  %v2295_v48 = vcombine.high %v2147_v49, %v5817_v26  ;;  %v2656_v36 = vpack.c.bf16 %v6811_v34, %v6811_v34  ;;  %v5502_v9 = vld [vmem:[%s7562_s5 + $0x254] ss:$8 sps:$4 sm:$0xff]  }
 0x3f9   : > { %v5129_v0 = vpack.i.bf16 %v2292_v56, %v2218_v54  ;;  %v2220_v15 = vcombine.high %v2218_v54, %v5817_v26  ;;  %v2294_v17 = vcombine.high %v2292_v56, %v5817_v26  ;;  %v5505_v56 = vld [vmem:[%s7562_s5 + $0x264] ss:$8 sps:$4 sm:$0xff]  }
 0x3fb   : > { %2318 = vrot.lane.b32.xlu1 %v2194_v58, %s5820_s26  ;;  %5115 = vrot.lane.b32.xlu0 %v5114_v55, %s5821_s27  ;;  %v5134_v22 = vpack.i.bf16 %v2294_v17, %v2220_v15  ;;  %v5491_v55 = vld [vmem:[%s7562_s5 + $0x220] ss:$8 sps:$4 sm:$0xff]  }
 0x3fc   : > { %v5503_v17 = vld [vmem:[%s7562_s5 + $0x260] ss:$8 sps:$4 sm:$0xff]  }
 0x3ff   : > { %2320 = vrot.lane.b32.xlu1 %v2268_v60, %s5820_s26  ;;  %2338 = vrot.lane.b32.xlu0 %v2195_v62, %s5822_s28  ;;  %v5494_v60 = vld [vmem:[%s7562_s5 + $0x230] ss:$8 sps:$4 sm:$0xff]   ;;  %v5499_v62 = vld [vmem:[%s7562_s5 + $0x244] ss:$8 sps:$4 sm:$0xff]  }
 0x403   : > { %2340 = vrot.lane.b32.xlu0 %v2269_v5, %s5822_s28  ;;  %5120 = vrot.lane.b32.xlu1 %v5119_v6, %s5823_s29 }
 0x407   : > { %5125 = vrot.lane.b32.xlu0 %v5124_v10, %s5824_s14  ;;  %2358 = vrot.lane.b32.xlu1 %v2196_v11, %s5825_s16 }
 0x40b   : > { %2378 = vrot.lane.b32.xlu0 %v2219_v13, %s5814_s25  ;;  %2360 = vrot.lane.b32.xlu1 %v2270_v20, %s5825_s16  ;;  %v5500_v20 = vld [vmem:[%s7562_s5 + $0x250] ss:$8 sps:$4 sm:$0xff]   ;;  %s323_s16 = sand.u32 1, %s5802_s10  }
 0x40c   : > { %s4325_s26 = scalar_lea.sflag [#allocation3], %s323_s16 }
 0x40f   : > { %5130 = vrot.lane.b32.xlu0 %v5129_v0, %s5826_s17  ;;  %2380 = vrot.lane.b32.xlu1 %v2293_v14, %s5814_s25  ;;  %s4969_s17 = sshll.u32 %s5901_s13, 4  ;;  %s5829_s13 = smov [#allocation2]  }
 0x410   : > { %s7514_s24 = scalar_lea.hbm %s7566_s9, %s4969_s17  ;;  %s5752_s28 = sshll.u32 %s5829_s13, 4  ;;  %s5753_s28 = int_to_ptr.vmem [resolvable:$false] %s5752_s28 }
 0x411   : > { %s5754_s29 = scalar_lea.vmem %s5753_s28, 32 }
 0x413   : > { %2408 = vrot.lane.b32.xlu0 %v2221_v21, %s5827_s21  ;;  %5135 = vrot.lane.b32.xlu1 %v5134_v22, %s5828_s22  ;;  %v5508_v22 = vld [vmem:[%s7562_s5 + $0x274] ss:$8 sps:$4 sm:$0xff]  }
 0x417   : > { %2410 = vrot.lane.b32.xlu1 %v2295_v48, %s5827_s21  ;;  %v5506_v48 = vld [vmem:[%s7562_s5 + $0x270] ss:$8 sps:$4 sm:$0xff]   ;;  %s324_s21 = scalar_lea.vmem [#allocation2], %s323_s16 }
 0x418   : > { %s4337_s22 = sshll.u32 %s324_s21, 4  ;;  %s7516_s22 = int_to_ptr.vmem [resolvable:$true] %s4337_s22 }
 0x419   : > { %s5748_s27 = scalar_lea.vmem %s7516_s22, 16  ;;  %p5755_p0 = scmp.lt.s32.totalorder %s7516_s22, %s5753_s28 }
 0x41a   : > { %p5749_p11 = scmp.ne.s32.totalorder %s7516_s22, %s5748_s27  ;;  %p5756_p1 = scmp.lt.s32.totalorder %s5754_s29, %s5748_s27 }
 0x41c   : > { %p5750_p12 = pnand %p5749_p11, %p5918_p5  ;;  %p5757_p2 = por %p5756_p1, %p5755_p0 }
 0x41e   : > { %p5751_p13 = pneg %p5750_p12 }
 0x420   : > { %p5758_p3 = pnand %p5757_p2, %p5751_p13 }
 0x469   : > { %v5111_v61 = vpop.permute.xlu0 %5110  ;;  %v5106_v46 = vpop.permute.xlu1 %5105 }
 0x46a   : > { %v5113_v50 = vunpack.i.h.bf16 %v5111_v61  ;;  %v5112_v23 = vunpack.i.l.bf16 %v5111_v61  ;;  %v5108_v24 = vunpack.i.h.bf16 %v5106_v46  ;;  %v5107_v16 = vunpack.i.l.bf16 %v5106_v46  ;;  %v5511_v61 = vld [vmem:[%s7562_s5 + $0x284] ss:$8 sps:$4 sm:$0xff]   ;;  %v5509_v46 = vld [vmem:[%s7562_s5 + $0x280] ss:$8 sps:$4 sm:$0xff]  }
 0x46c   : > { %v2303_v53 = vsel %vm2302_vm10, %v5112_v23, %v5113_v50  ;;  %v2313_v51 = vsel %vm2312_vm11, %v5107_v16, %v5108_v24  ;;  %v2416_v52 = vsel %vm2302_vm10, %v6807_v32, %v5112_v23  ;;  %v5485_v32 = vld [vmem:[%s7562_s5 + $0x200] ss:$8 sps:$4 sm:$0xff]   ;;  %v5514_v50 = vld [vmem:[%s7562_s5 + $0x294] ss:$8 sps:$4 sm:$0xff]   ;;  %v5512_v23 = vld [vmem:[%s7562_s5 + $0x290] ss:$8 sps:$4 sm:$0xff]  }
 0x46d   : > { %v2417_v27 = vsel %vm2312_vm11, %v2303_v53, %v5107_v16  ;;  %v2319_v28 = vpop.permute.xlu1 %2318  ;;  %v6851_v25 = vpop.permute.xlu0 %5115  ;;  %v2657_v29 = vpack.c.bf16 %v2416_v52, %v2416_v52  ;;  %v5517_v24 = vld [vmem:[%s7562_s5 + $0x2a4] ss:$8 sps:$4 sm:$0xff]   ;;  %v5515_v16 = vld [vmem:[%s7562_s5 + $0x2a0] ss:$8 sps:$4 sm:$0xff]   ;;  %v5520_v53 = vld [vmem:[%s7562_s5 + $0x2b4] ss:$8 sps:$4 sm:$0xff]  }
 0x46e   : > { %v2418_v26 = vsel %vm2322_vm12, %v2313_v51, %v2319_v28  ;;  %v5118_v30 = vunpack.i.h.bf16 %v6851_v25  ;;  %v5117_v33 = vunpack.i.l.bf16 %v6851_v25  ;;  %v2658_v38 = vpack.c.bf16 %v2417_v27, %v2417_v27  ;;  %v5518_v51 = vld [vmem:[%s7562_s5 + $0x2b0] ss:$8 sps:$4 sm:$0xff]   ;;  %v5523_v52 = vld [vmem:[%s7562_s5 + $0x2c4] ss:$8 sps:$4 sm:$0xff]   ;;  %v5521_v27 = vld [vmem:[%s7562_s5 + $0x2c0] ss:$8 sps:$4 sm:$0xff]  }
 0x46f   : > { %v2659_v37 = vpack.c.bf16 %v2418_v26, %v2418_v26  ;;  %3862 = vmatprep.mubr.bf16.mxu1 %v2657_v29  ;;  %v5524_v29 = vld [vmem:[%s7562_s5 + $0x2d0] ss:$8 sps:$4 sm:$0xff]   ;;  %v5529_v26 = vld [vmem:[%s7562_s5 + $0x2e4] ss:$8 sps:$4 sm:$0xff]  }
 0x470   : > { %3863 = vmatmul.mubr.bf16.vlgmr.msra.gmra.mrb[16].mxu1 %v2656_v36  ;;  %v2333_v39 = vsel %vm2332_vm13, %v5117_v33, %v5118_v30  ;;  %v5527_v36 = vld [vmem:[%s7562_s5 + $0x2e0] ss:$8 sps:$4 sm:$0xff]   ;;  %v5536_v25 = vld [vmem:[%s7562_s5 + $0x310] ss:$8 sps:$4 sm:$0xff]  }
 0x471   : > { %3903 = vmatprep.mubr.bf16.mxu0 %v2659_v37  ;;  %v2321_v41 = vpop.permute.xlu1 %2320  ;;  %v2339_v34 = vpop.permute.xlu0 %2338  ;;  %v5532_v37 = vld [vmem:[%s7562_s5 + $0x2f4] ss:$8 sps:$4 sm:$0xff]  }
 0x472   : > { %v6868_v42 = vsel %vm2322_vm12, %v2319_v28, %v2321_v41  ;;  %v2420_v18 = vsel %vm2342_vm14, %v2333_v39, %v2339_v34  ;;  %3904 = vmatmul.mubr.bf16.vlgmr.msra.gmra.mrb[16].mxu0 %v2658_v38  ;;  %v5526_v28 = vld [vmem:[%s7562_s5 + $0x2d4] ss:$8 sps:$4 sm:$0xff]   ;;  %v5530_v38 = vld [vmem:[%s7562_s5 + $0x2f0] ss:$8 sps:$4 sm:$0xff]   ;;  %v5535_v39 = vld [vmem:[%s7562_s5 + $0x304] ss:$8 sps:$4 sm:$0xff]  }
 0x473   : > { %v2661_v19 = vpack.c.bf16 %v2420_v18, %v2420_v18  ;;  %3913 = vmatpush1.bf16.msra.mxu0 %v5485_v32 }
 0x474   : > { %3914 = vmatprep.subr.bf16.mxu0 %v5490_v40  ;;  %v2419_v40 = vsel %vm2332_vm13, %v6868_v42, %v5117_v33  ;;  %v5541_v33 = vld [vmem:[%s7562_s5 + $0x324] ss:$8 sps:$4 sm:$0xff]   ;;  %v5539_v42 = vld [vmem:[%s7562_s5 + $0x320] ss:$8 sps:$4 sm:$0xff]  }
 0x475   : > { %3944 = vmatprep.mubr.bf16.mxu0 %v2661_v19  ;;  %v2341_v45 = vpop.permute.xlu0 %2340  ;;  %v6877_v47 = vpop.permute.xlu1 %5120  ;;  %v2660_v18 = vpack.c.bf16 %v2419_v40, %v2419_v40  ;;  %v5538_v19 = vld [vmem:[%s7562_s5 + $0x314] ss:$8 sps:$4 sm:$0xff]   ;;  %v5599_v40 = vld [vmem:[%s7562_s5 + $0x460] ss:$8 sps:$4 sm:$0xff]  }
 0x476   : > { %v2343_v49 = vsel %vm2342_vm14, %v2339_v34, %v2341_v45  ;;  %v5122_v58 = vunpack.i.l.bf16 %v6877_v47  ;;  %v5123_v30 = vunpack.i.h.bf16 %v6877_v47  ;;  %v5533_v34 = vld [vmem:[%s7562_s5 + $0x300] ss:$8 sps:$4 sm:$0xff]   ;;  %v5542_v45 = vld [vmem:[%s7562_s5 + $0x330] ss:$8 sps:$4 sm:$0xff]   ;;  %v5547_v47 = vld [vmem:[%s7562_s5 + $0x344] ss:$8 sps:$4 sm:$0xff]  }
 0x477   : > { %3915 = vmatpush1.bf16.msra.mxu0 %v5488_v43 }
 0x478   : > { %v6887_v57 = vsel %vm2352_vm15, %v2343_v49, %v5122_v58  ;;  %3916 = vmatprep.subr.bf16.mxu0 %v5493_v44  ;;  %v2353_v32 = vsel %vm2352_vm15, %v5122_v58, %v5123_v30  ;;  %v5544_v44 = vld [vmem:[%s7562_s5 + $0x334] ss:$8 sps:$4 sm:$0xff]   ;;  %v5545_v49 = vld [vmem:[%s7562_s5 + $0x340] ss:$8 sps:$4 sm:$0xff]   ;;  %v5590_v30 = vld [vmem:[%s7562_s5 + $0x430] ss:$8 sps:$4 sm:$0xff]  }
 0x479   : > { %v6892_v63 = vpop.permute.xlu0 %5125  ;;  %v6894_v3 = vpop.permute.xlu1 %2358  ;;  %v5550_v58 = vld [vmem:[%s7562_s5 + $0x354] ss:$8 sps:$4 sm:$0xff]  }
 0x47a   : > { %v5127_v4 = vunpack.i.l.bf16 %v6892_v63  ;;  %v2422_v41 = vsel %vm2362_vm2, %v2353_v32, %v6894_v3  ;;  %v5598_v32 = vld [vmem:[%s7562_s5 + $0x454] ss:$8 sps:$4 sm:$0xff]  }
 0x47b   : > { %3917 = vmatpush1.bf16.msra.mxu0 %v5491_v55  ;;  %v2663_v43 = vpack.c.bf16 %v2422_v41, %v2422_v41  ;;  %v5548_v55 = vld [vmem:[%s7562_s5 + $0x350] ss:$8 sps:$4 sm:$0xff]   ;;  %v5604_v41 = vld [vmem:[%s7562_s5 + $0x474] ss:$8 sps:$4 sm:$0xff]  }
 0x47c   : > { %3918 = vmatprep.subr.bf16.mxu0 %v5496_v59  ;;  %v5553_v59 = vld [vmem:[%s7562_s5 + $0x364] ss:$8 sps:$4 sm:$0xff]  }
 0x47d   : > { %v6903_v1 = vpop.permute.xlu0 %2378  ;;  %v2361_v5 = vpop.permute.xlu1 %2360 }
 0x47e   : > { %v2363_v6 = vsel %vm2362_vm2, %v6894_v3, %v2361_v5  ;;  %v5551_v3 = vld [vmem:[%s7562_s5 + $0x360] ss:$8 sps:$4 sm:$0xff]   ;;  %v5559_v5 = vld [vmem:[%s7562_s5 + $0x384] ss:$8 sps:$4 sm:$0xff]  }
 0x47f   : > { %v6910_v7 = vsel %vm2372_vm3, %v2363_v6, %v5127_v4  ;;  %3919 = vmatpush1.bf16.msra.mxu0 %v5494_v60  ;;  %v5556_v60 = vld [vmem:[%s7562_s5 + $0x374] ss:$8 sps:$4 sm:$0xff]   ;;  %v5557_v6 = vld [vmem:[%s7562_s5 + $0x380] ss:$8 sps:$4 sm:$0xff]  }
 0x480   : > { %3920 = vmatprep.subr.bf16.mxu0 %v5499_v62  ;;  %v5554_v62 = vld [vmem:[%s7562_s5 + $0x370] ss:$8 sps:$4 sm:$0xff]  }
 0x481   : > { %v6918_v10 = vpop.permute.xlu0 %5130  ;;  %v2381_v11 = vpop.permute.xlu1 %2380 }
 0x482   : > { %v5132_v12 = vunpack.i.l.bf16 %v6918_v10  ;;  %v2382_v13 = vsel %vm2119_vm9, %v6903_v1, %v2381_v11  ;;  %v5133_v14 = vunpack.i.h.bf16 %v6918_v10  ;;  %v5565_v11 = vld [vmem:[%s7562_s5 + $0x3a4] ss:$8 sps:$4 sm:$0xff]   ;;  %v5632_v10 = vld [vmem:[%s7562_s5 + $0x510] ss:$8 sps:$4 sm:$0xff]  }
 0x483   : > { %3921 = vmatpush1.bf16.msra.mxu0 %v5497_v8  ;;  %v5562_v8 = vld [vmem:[%s7562_s5 + $0x394] ss:$8 sps:$4 sm:$0xff]  }
 0x484   : > { %v6929_v54 = vsel %vm2391_vm4, %v2382_v13, %v5132_v12  ;;  %3922 = vmatprep.subr.bf16.mxu0 %v5502_v9  ;;  %v5560_v9 = vld [vmem:[%s7562_s5 + $0x390] ss:$8 sps:$4 sm:$0xff]   ;;  %v5563_v13 = vld [vmem:[%s7562_s5 + $0x3a0] ss:$8 sps:$4 sm:$0xff]  }
 0x485   : > { %v6934_v0 = vpop.permute.xlu1 %5135 }
 0x486   : > { %v5137_v15 = vunpack.i.l.bf16 %v6934_v0 }
 0x487   : > { %3923 = vmatpush1.bf16.msra.mxu0 %v5500_v20  ;;  %v5568_v20 = vld [vmem:[%s7562_s5 + $0x3b4] ss:$8 sps:$4 sm:$0xff]  }
 0x488   : > { %v6946_v21 = vsel %vm2402_vm5, %v5133_v14, %v5137_v15  ;;  %3924 = vmatprep.subr.bf16.mxu0 %v5505_v56  ;;  %v5566_v56 = vld [vmem:[%s7562_s5 + $0x3b0] ss:$8 sps:$4 sm:$0xff]  }
 0x48b   : > { %3925 = vmatpush1.bf16.msra.mxu0 %v5503_v17  ;;  %v5571_v17 = vld [vmem:[%s7562_s5 + $0x3c4] ss:$8 sps:$4 sm:$0xff]  }
 0x48c   : > { %3926 = vmatprep.subr.bf16.mxu0 %v5508_v22  ;;  %v5569_v22 = vld [vmem:[%s7562_s5 + $0x3c0] ss:$8 sps:$4 sm:$0xff]  }
 0x48f   : > { %3927 = vmatpush1.bf16.msra.mxu0 %v5506_v48  ;;  %v5574_v48 = vld [vmem:[%s7562_s5 + $0x3d4] ss:$8 sps:$4 sm:$0xff]  }
 0x490   : > { %3928 = vmatprep.subr.bf16.mxu0 %v5511_v61  ;;  %v5572_v61 = vld [vmem:[%s7562_s5 + $0x3d0] ss:$8 sps:$4 sm:$0xff]  }
 0x493   : > { %3929 = vmatpush1.bf16.msra.mxu0 %v5509_v46  ;;  %v5577_v46 = vld [vmem:[%s7562_s5 + $0x3e4] ss:$8 sps:$4 sm:$0xff]  }
 0x494   : > { %3930 = vmatprep.subr.bf16.mxu0 %v5514_v50  ;;  %v5128_v50 = vunpack.i.h.bf16 %v6892_v63  ;;  %v5581_v63 = vld [vmem:[%s7562_s5 + $0x400] ss:$8 sps:$4 sm:$0xff]  }
 0x497   : > { %3931 = vmatpush1.bf16.msra.mxu0 %v5512_v23  ;;  %v5575_v23 = vld [vmem:[%s7562_s5 + $0x3e0] ss:$8 sps:$4 sm:$0xff]  }
 0x498   : > { %3932 = vmatprep.subr.bf16.mxu0 %v5517_v24  ;;  %v5580_v24 = vld [vmem:[%s7562_s5 + $0x3f4] ss:$8 sps:$4 sm:$0xff]  }
 0x49b   : > { %3933 = vmatpush1.bf16.msra.mxu0 %v5515_v16  ;;  %v2373_v16 = vsel %vm2372_vm3, %v5127_v4, %v5128_v50  ;;  %v2662_v4 = vpack.c.bf16 %v6887_v57, %v6887_v57  ;;  %v5587_v57 = vld [vmem:[%s7562_s5 + $0x420] ss:$8 sps:$4 sm:$0xff]   ;;  %v5644_v50 = vld [vmem:[%s7562_s5 + $0x550] ss:$8 sps:$4 sm:$0xff]  }
 0x49c   : > { %3934 = vmatprep.subr.bf16.mxu0 %v5520_v53  ;;  %v5578_v53 = vld [vmem:[%s7562_s5 + $0x3f0] ss:$8 sps:$4 sm:$0xff]  }
 0x49f   : > { %3935 = vmatpush1.bf16.msra.mxu0 %v5518_v51  ;;  %v5583_v51 = vld [vmem:[%s7562_s5 + $0x404] ss:$8 sps:$4 sm:$0xff]  }
 0x4a0   : > { %3936 = vmatprep.subr.bf16.mxu0 %v5523_v52  ;;  %v2424_v52 = vsel %vm2119_vm9, %v2373_v16, %v6903_v1  ;;  %v5584_v1 = vld [vmem:[%s7562_s5 + $0x410] ss:$8 sps:$4 sm:$0xff]  }
 0x4a1   : > { %v5733_v16 = vld [vmem:[%s7564_s7 + $0x10] sm:$0xff]  }
 0x4a3   : > { %3937 = vmatpush1.bf16.msra.mxu0 %v5521_v27  ;;  %v5586_v27 = vld [vmem:[%s7562_s5 + $0x414] ss:$8 sps:$4 sm:$0xff]  }
 0x4a4   : > { %3938 = vmatprep.subr.bf16.mxu0 %v5526_v28  ;;  %v2665_v28 = vpack.c.bf16 %v2424_v52, %v2424_v52  ;;  %v5647_v52 = vld [vmem:[%s7562_s5 + $0x560] ss:$8 sps:$4 sm:$0xff]  }
 0x4a7   : > { %3939 = vmatpush1.bf16.msra.mxu0 %v5524_v29  ;;  %v5589_v29 = vld [vmem:[%s7562_s5 + $0x424] ss:$8 sps:$4 sm:$0xff]  }
 0x4a8   : > { %3940 = vmatprep.subr.bf16.mxu0 %v5529_v26  ;;  %v5592_v26 = vld [vmem:[%s7562_s5 + $0x434] ss:$8 sps:$4 sm:$0xff]  }
 0x4ab   : > { %3941 = vmatpush1.bf16.msra.mxu0 %v5527_v36  ;;  %v5595_v36 = vld [vmem:[%s7562_s5 + $0x444] ss:$8 sps:$4 sm:$0xff]  }
 0x4ac   : > { %3942 = vmatprep.subr.bf16.mxu0 %v5532_v37  ;;  %v5593_v37 = vld [vmem:[%s7562_s5 + $0x440] ss:$8 sps:$4 sm:$0xff]  }
 0x4af   : > { %3943 = vmatpush1.bf16.msra.mxu0 %v5530_v38  ;;  %v5596_v38 = vld [vmem:[%s7562_s5 + $0x450] ss:$8 sps:$4 sm:$0xff]  }
 0x4b0   : > { %3953 = vmatprep.subr.bf16.mxu0 %v5535_v39  ;;  %v5601_v39 = vld [vmem:[%s7562_s5 + $0x464] ss:$8 sps:$4 sm:$0xff]  }
 0x4b2   : > { %3945 = vmatmul.mubr.bf16.vlgmr.msra.gmra.mrb[16].mxu0 %v2660_v18  ;;  %v5607_v18 = vld [vmem:[%s7562_s5 + $0x484] ss:$8 sps:$4 sm:$0xff]  }
 0x4b3   : > { %3954 = vmatpush1.bf16.msra.mxu0 %v5533_v34  ;;  %3985 = vmatprep.mubr.bf16.mxu0 %v2663_v43  ;;  %v5602_v34 = vld [vmem:[%s7562_s5 + $0x470] ss:$8 sps:$4 sm:$0xff]   ;;  %v5610_v43 = vld [vmem:[%s7562_s5 + $0x494] ss:$8 sps:$4 sm:$0xff]  }
 0x4b4   : > { %3955 = vmatprep.subr.bf16.mxu0 %v5538_v19  ;;  %v5605_v19 = vld [vmem:[%s7562_s5 + $0x480] ss:$8 sps:$4 sm:$0xff]  }
 0x4b7   : > { %3956 = vmatpush1.bf16.msra.mxu0 %v5536_v25  ;;  %v5608_v25 = vld [vmem:[%s7562_s5 + $0x490] ss:$8 sps:$4 sm:$0xff]  }
 0x4b8   : > { %3957 = vmatprep.subr.bf16.mxu0 %v5541_v33  ;;  %v5613_v33 = vld [vmem:[%s7562_s5 + $0x4a4] ss:$8 sps:$4 sm:$0xff]  }
 0x4bb   : > { %3958 = vmatpush1.bf16.msra.mxu0 %v5539_v42  ;;  %v5611_v42 = vld [vmem:[%s7562_s5 + $0x4a0] ss:$8 sps:$4 sm:$0xff]  }
 0x4bc   : > { %3959 = vmatprep.subr.bf16.mxu0 %v5544_v44  ;;  %v5616_v44 = vld [vmem:[%s7562_s5 + $0x4b4] ss:$8 sps:$4 sm:$0xff]  }
 0x4bf   : > { %3960 = vmatpush1.bf16.msra.mxu0 %v5542_v45  ;;  %v5614_v45 = vld [vmem:[%s7562_s5 + $0x4b0] ss:$8 sps:$4 sm:$0xff]  }
 0x4c0   : > { %3961 = vmatprep.subr.bf16.mxu0 %v5547_v47  ;;  %v5619_v47 = vld [vmem:[%s7562_s5 + $0x4c4] ss:$8 sps:$4 sm:$0xff]  }
 0x4c3   : > { %3962 = vmatpush1.bf16.msra.mxu0 %v5545_v49  ;;  %v5617_v49 = vld [vmem:[%s7562_s5 + $0x4c0] ss:$8 sps:$4 sm:$0xff]  }
 0x4c4   : > { %3963 = vmatprep.subr.bf16.mxu0 %v5550_v58  ;;  %v5622_v58 = vld [vmem:[%s7562_s5 + $0x4d4] ss:$8 sps:$4 sm:$0xff]  }
 0x4c7   : > { %3964 = vmatpush1.bf16.msra.mxu0 %v5548_v55  ;;  %v5620_v55 = vld [vmem:[%s7562_s5 + $0x4d0] ss:$8 sps:$4 sm:$0xff]  }
 0x4c8   : > { %3965 = vmatprep.subr.bf16.mxu0 %v5553_v59  ;;  %v5625_v59 = vld [vmem:[%s7562_s5 + $0x4e4] ss:$8 sps:$4 sm:$0xff]  }
 0x4cb   : > { %3966 = vmatpush1.bf16.msra.mxu0 %v5551_v3  ;;  %v5623_v3 = vld [vmem:[%s7562_s5 + $0x4e0] ss:$8 sps:$4 sm:$0xff]  }
 0x4cc   : > { %3967 = vmatprep.subr.bf16.mxu0 %v5556_v60  ;;  %v5628_v60 = vld [vmem:[%s7562_s5 + $0x4f4] ss:$8 sps:$4 sm:$0xff]  }
 0x4cf   : > { %3968 = vmatpush1.bf16.msra.mxu0 %v5554_v62  ;;  %v5626_v62 = vld [vmem:[%s7562_s5 + $0x4f0] ss:$8 sps:$4 sm:$0xff]  }
 0x4d0   : > { %3969 = vmatprep.subr.bf16.mxu0 %v5559_v5  ;;  %v5631_v5 = vld [vmem:[%s7562_s5 + $0x504] ss:$8 sps:$4 sm:$0xff]  }
 0x4d3   : > { %3970 = vmatpush1.bf16.msra.mxu0 %v5557_v6  ;;  %v2392_v6 = vsel %vm2391_vm4, %v5132_v12, %v5133_v14  ;;  %v5637_v12 = vld [vmem:[%s7562_s5 + $0x524] ss:$8 sps:$4 sm:$0xff]   ;;  %v5640_v14 = vld [vmem:[%s7562_s5 + $0x534] ss:$8 sps:$4 sm:$0xff]  }
 0x4d4   : > { %3971 = vmatprep.subr.bf16.mxu0 %v5562_v8  ;;  %v5629_v8 = vld [vmem:[%s7562_s5 + $0x500] ss:$8 sps:$4 sm:$0xff]  }
 0x4d7   : > { %3972 = vmatpush1.bf16.msra.mxu0 %v5560_v9  ;;  %v2664_v9 = vpack.c.bf16 %v6910_v7, %v6910_v7  ;;  %v5635_v7 = vld [vmem:[%s7562_s5 + $0x520] ss:$8 sps:$4 sm:$0xff]  }
 0x4d8   : > { %3973 = vmatprep.subr.bf16.mxu0 %v5565_v11  ;;  %v5634_v11 = vld [vmem:[%s7562_s5 + $0x514] ss:$8 sps:$4 sm:$0xff]  }
 0x4db   : > { %3974 = vmatpush1.bf16.msra.mxu0 %v5563_v13  ;;  %v2667_v13 = vpack.c.bf16 %v2392_v6, %v2392_v6  ;;  %v5685_v6 = vld [vmem:[%s7562_s5 + $0x624] ss:$8 sps:$4 sm:$0xff]  }
 0x4dc   : > { %3975 = vmatprep.subr.bf16.mxu0 %v5568_v20  ;;  %v5638_v20 = vld [vmem:[%s7562_s5 + $0x530] ss:$8 sps:$4 sm:$0xff]  }
 0x4df   : > { %3976 = vmatpush1.bf16.msra.mxu0 %v5566_v56  ;;  %v5643_v56 = vld [vmem:[%s7562_s5 + $0x544] ss:$8 sps:$4 sm:$0xff]  }
 0x4e0   : > { %3977 = vmatprep.subr.bf16.mxu0 %v5571_v17  ;;  %v5731_v17 = vld [vmem:[%s7564_s7] sm:$0xff]  }
 0x4e1   : > { %4271 = vmatpush1.bf16.msra.mxu1 %v5731_v17  ;;  %v5703_v17 = vld [vmem:[%s7562_s5 + $0x684] ss:$8 sps:$4 sm:$0xff]  }
 0x4e2   : > { %4272 = vmatprep.subr.bf16.mxu1 %v5812_v2 }
 0x4e3   : > { %3978 = vmatpush1.bf16.msra.mxu0 %v5569_v22  ;;  %v5641_v22 = vld [vmem:[%s7562_s5 + $0x540] ss:$8 sps:$4 sm:$0xff]  }
 0x4e4   : > { %3979 = vmatprep.subr.bf16.mxu0 %v5574_v48  ;;  %v5646_v48 = vld [vmem:[%s7562_s5 + $0x554] ss:$8 sps:$4 sm:$0xff]  }
 0x4e7   : > { %3980 = vmatpush1.bf16.msra.mxu0 %v5572_v61  ;;  %v5732_v61 = vld [vmem:[%s7564_s7 + $0x8] sm:$0xff]  }
 0x4e8   : > { %3981 = vmatprep.subr.bf16.mxu0 %v5577_v46  ;;  %4273 = vmatpush1.bf16.msra.mxu1 %v5732_v61  ;;  %v5704_v61 = vld [vmem:[%s7562_s5 + $0x690] ss:$8 sps:$4 sm:$0xff]  }
 0x4e9   : > { %4274 = vmatprep.subr.bf16.mxu1 %v5812_v2 }
 0x4eb   : > { %3982 = vmatpush1.bf16.msra.mxu0 %v5575_v23 }
 0x4ec   : > { %3983 = vmatprep.subr.bf16.mxu0 %v5580_v24  ;;  %v5649_v24 = vld [vmem:[%s7562_s5 + $0x564] ss:$8 sps:$4 sm:$0xff]   ;;  %4275 = vmatpush1.bf16.msra.mxu1 %v5733_v16  ;;  %v5712_v16 = vld [vmem:[%s7562_s5 + $0x6b4] ss:$8 sps:$4 sm:$0xff]  }
 0x4ed   : > { %4276 = vmatprep.subr.bf16.mxu1 %v5812_v2 }
 0x4ef   : > { %3984 = vmatpush1.bf16.msra.mxu0 %v5578_v53 }
 0x4f0   : > { %3994 = vmatprep.subr.bf16.mxu0 %v5583_v51 }
 0x4f2   : > { %3986 = vmatmul.mubr.bf16.vlgmr.msra.gmra.mrb[16].mxu0 %v2662_v4  ;;  %v5734_v4 = vld [vmem:[%s7564_s7 + $0x18] sm:$0xff]  }
 0x4f3   : > { %3995 = vmatpush1.bf16.msra.mxu0 %v5581_v63  ;;  %4026 = vmatprep.mubr.bf16.mxu0 %v2665_v28  ;;  %v5652_v63 = vld [vmem:[%s7562_s5 + $0x574] ss:$8 sps:$4 sm:$0xff]   ;;  %v5655_v28 = vld [vmem:[%s7562_s5 + $0x584] ss:$8 sps:$4 sm:$0xff]  }
 0x4f4   : > { %3996 = vmatprep.subr.bf16.mxu0 %v5586_v27  ;;  %v5650_v27 = vld [vmem:[%s7562_s5 + $0x570] ss:$8 sps:$4 sm:$0xff]   ;;  %4277 = vmatpush1.bf16.msra.mxu1 %v5734_v4 }
 0x4f5   : > { %4278 = vmatprep.subr.bf16.mxu1 %v5812_v2  ;;  %v5716_v4 = vld [vmem:[%s7562_s5 + $0x6d0] ss:$8 sps:$4 sm:$0xff]  }
 0x4f7   : > { %3997 = vmatpush1.bf16.msra.mxu0 %v5584_v1  ;;  %v5735_v1 = vld [vmem:[%s7564_s7 + $0x20] sm:$0xff]  }
 0x4f8   : > { %3998 = vmatprep.subr.bf16.mxu0 %v5589_v29  ;;  %v5653_v29 = vld [vmem:[%s7562_s5 + $0x580] ss:$8 sps:$4 sm:$0xff]   ;;  %4279 = vmatpush1.bf16.msra.mxu1 %v5735_v1  ;;  %v5724_v1 = vld [vmem:[%s7562_s5 + $0x6f4] ss:$8 sps:$4 sm:$0xff]  }
 0x4f9   : > { %4280 = vmatprep.subr.bf16.mxu1 %v5812_v2 }
 0x4fb   : > { %3999 = vmatpush1.bf16.msra.mxu0 %v5587_v57  ;;  %v5658_v57 = vld [vmem:[%s7562_s5 + $0x594] ss:$8 sps:$4 sm:$0xff]  }
 0x4fc   : > { %4000 = vmatprep.subr.bf16.mxu0 %v5592_v26  ;;  %v5736_v26 = vld [vmem:[%s7564_s7 + $0x28] sm:$0xff]  }
 0x4fd   : > { %4281 = vmatpush1.bf16.msra.mxu1 %v5736_v26  ;;  %v5725_v26 = vld [vmem:[%s7562_s5 + $0x700] ss:$8 sps:$4 sm:$0xff]  }
 0x4fe   : > { %4282 = vmatprep.subr.bf16.mxu1 %v5812_v2 }
 0x4ff   : > { %4001 = vmatpush1.bf16.msra.mxu0 %v5590_v30  ;;  %v5656_v30 = vld [vmem:[%s7562_s5 + $0x590] ss:$8 sps:$4 sm:$0xff]  }
 0x500   : > { %4002 = vmatprep.subr.bf16.mxu0 %v5595_v36  ;;  %v5661_v36 = vld [vmem:[%s7562_s5 + $0x5a4] ss:$8 sps:$4 sm:$0xff]  }
 0x503   : > { %4003 = vmatpush1.bf16.msra.mxu0 %v5593_v37  ;;  %v5737_v37 = vld [vmem:[%s7564_s7 + $0x30] sm:$0xff]  }
 0x504   : > { %4004 = vmatprep.subr.bf16.mxu0 %v5598_v32  ;;  %v5659_v32 = vld [vmem:[%s7562_s5 + $0x5a0] ss:$8 sps:$4 sm:$0xff]   ;;  %4283 = vmatpush1.bf16.msra.mxu1 %v5737_v37  ;;  %v5730_v37 = vld [vmem:[%s7562_s5 + $0x710] ss:$8 sps:$4 sm:$0x3f]  }
 0x505   : > { %4284 = vmatprep.subr.bf16.mxu1 %v5812_v2 }
 0x507   : > { %4005 = vmatpush1.bf16.msra.mxu0 %v5596_v38  ;;  %v5664_v38 = vld [vmem:[%s7562_s5 + $0x5b4] ss:$8 sps:$4 sm:$0xff]  }
 0x508   : > { %4006 = vmatprep.subr.bf16.mxu0 %v5601_v39  ;;  %v5738_v39 = vld [vmem:[%s7564_s7 + $0x38] sm:$0xff]  }
 0x509   : > { %4285 = vmatpush1.bf16.msra.mxu1 %v5738_v39 }
 0x50a   : > { %4286 = vmatprep.subr.bf16.mxu1 %v5812_v2 }
 0x50b   : > { %4007 = vmatpush1.bf16.msra.mxu0 %v5599_v40  ;;  %v5662_v40 = vld [vmem:[%s7562_s5 + $0x5b0] ss:$8 sps:$4 sm:$0xff]  }
 0x50c   : > { %4008 = vmatprep.subr.bf16.mxu0 %v5604_v41  ;;  %v5667_v41 = vld [vmem:[%s7562_s5 + $0x5c4] ss:$8 sps:$4 sm:$0xff]  }
 0x50f   : > { %4009 = vmatpush1.bf16.msra.mxu0 %v5602_v34  ;;  %v5739_v34 = vld [vmem:[%s7564_s7 + $0x40] sm:$0xff]  }
 0x510   : > { %4010 = vmatprep.subr.bf16.mxu0 %v5607_v18  ;;  %v5665_v18 = vld [vmem:[%s7562_s5 + $0x5c0] ss:$8 sps:$4 sm:$0xff]   ;;  %4287 = vmatpush1.bf16.msra.mxu1 %v5739_v34 }
 0x511   : > { %4288 = vmatprep.subr.bf16.mxu1 %v5812_v2 }
 0x513   : > { %4011 = vmatpush1.bf16.msra.mxu0 %v5605_v19  ;;  %v5670_v19 = vld [vmem:[%s7562_s5 + $0x5d4] ss:$8 sps:$4 sm:$0xff]  }
 0x514   : > { %4012 = vmatprep.subr.bf16.mxu0 %v5610_v43  ;;  %v5740_v43 = vld [vmem:[%s7564_s7 + $0x48] sm:$0xff]  }
 0x515   : > { %4289 = vmatpush1.bf16.msra.mxu1 %v5740_v43 }
 0x516   : > { %4290 = vmatprep.subr.bf16.mxu1 %v5812_v2 }
 0x517   : > { %4013 = vmatpush1.bf16.msra.mxu0 %v5608_v25  ;;  %v5668_v25 = vld [vmem:[%s7562_s5 + $0x5d0] ss:$8 sps:$4 sm:$0xff]  }
 0x518   : > { %4014 = vmatprep.subr.bf16.mxu0 %v5613_v33  ;;  %v5673_v33 = vld [vmem:[%s7562_s5 + $0x5e4] ss:$8 sps:$4 sm:$0xff]  }
 0x51b   : > { %4015 = vmatpush1.bf16.msra.mxu0 %v5611_v42  ;;  %v5741_v42 = vld [vmem:[%s7564_s7 + $0x50] sm:$0xff]  }
 0x51c   : > { %4016 = vmatprep.subr.bf16.mxu0 %v5616_v44  ;;  %v5138_v44 = vunpack.i.h.bf16 %v6934_v0  ;;  %4291 = vmatpush1.bf16.msra.mxu1 %v5741_v42  ;;  %v5677_v0 = vld [vmem:[%s7562_s5 + $0x600] ss:$8 sps:$4 sm:$0xff]  }
 0x51d   : > { %4292 = vmatprep.subr.bf16.mxu1 %v5812_v2 }
 0x51f   : > { %4017 = vmatpush1.bf16.msra.mxu0 %v5614_v45  ;;  %v5671_v45 = vld [vmem:[%s7562_s5 + $0x5e0] ss:$8 sps:$4 sm:$0xff]  }
 0x520   : > { %4018 = vmatprep.subr.bf16.mxu0 %v5619_v47  ;;  %v5676_v47 = vld [vmem:[%s7562_s5 + $0x5f4] ss:$8 sps:$4 sm:$0xff]  }
 0x523   : > { %4019 = vmatpush1.bf16.msra.mxu0 %v5617_v49  ;;  %v2403_v49 = vsel %vm2402_vm5, %v5137_v15, %v5138_v44  ;;  %v2666_v15 = vpack.c.bf16 %v6929_v54, %v6929_v54  ;;  %v5683_v54 = vld [vmem:[%s7562_s5 + $0x620] ss:$8 sps:$4 sm:$0xff]  }
 0x524   : > { %4020 = vmatprep.subr.bf16.mxu0 %v5622_v58  ;;  %v5674_v58 = vld [vmem:[%s7562_s5 + $0x5f0] ss:$8 sps:$4 sm:$0xff]  }
 0x527   : > { %4021 = vmatpush1.bf16.msra.mxu0 %v5620_v55  ;;  %v5679_v55 = vld [vmem:[%s7562_s5 + $0x604] ss:$8 sps:$4 sm:$0xff]  }
 0x528   : > { %4022 = vmatprep.subr.bf16.mxu0 %v5625_v59  ;;  %v7370_v59 = vpop.permute.xlu0 %2408 }
 0x52b   : > { %4023 = vmatpush1.bf16.msra.mxu0 %v5623_v3  ;;  %v2427_v3 = vsel %vm2412_vm6, %v2403_v49, %v7370_v59 }
 0x52c   : > { %4024 = vmatprep.subr.bf16.mxu0 %v5628_v60  ;;  %v5682_v60 = vld [vmem:[%s7562_s5 + $0x614] ss:$8 sps:$4 sm:$0xff]  }
 0x52f   : > { %4025 = vmatpush1.bf16.msra.mxu0 %v5626_v62  ;;  %v2669_v62 = vpack.c.bf16 %v2427_v3, %v2427_v3 }
 0x530   : > { %4035 = vmatprep.subr.bf16.mxu0 %v5631_v5  ;;  %v5680_v5 = vld [vmem:[%s7562_s5 + $0x610] ss:$8 sps:$4 sm:$0xff]  }
 0x532   : > { %4027 = vmatmul.mubr.bf16.vlgmr.msra.gmra.mrb[16].mxu0 %v2664_v9  ;;  %v5686_v9 = vld [vmem:[%s7562_s5 + $0x630] ss:$8 sps:$4 sm:$0xff]  }
 0x533   : > { %4036 = vmatpush1.bf16.msra.mxu0 %v5629_v8  ;;  %4067 = vmatprep.mubr.bf16.mxu0 %v2667_v13  ;;  %v5688_v8 = vld [vmem:[%s7562_s5 + $0x634] ss:$8 sps:$4 sm:$0xff]   ;;  %v5689_v13 = vld [vmem:[%s7562_s5 + $0x640] ss:$8 sps:$4 sm:$0xff]  }
 0x534   : > { %4037 = vmatprep.subr.bf16.mxu0 %v5634_v11  ;;  %v5691_v11 = vld [vmem:[%s7562_s5 + $0x644] ss:$8 sps:$4 sm:$0xff]  }
 0x537   : > { %4038 = vmatpush1.bf16.msra.mxu0 %v5632_v10  ;;  %v5694_v10 = vld [vmem:[%s7562_s5 + $0x654] ss:$8 sps:$4 sm:$0xff]  }
 0x538   : > { %4039 = vmatprep.subr.bf16.mxu0 %v5637_v12  ;;  %v5692_v12 = vld [vmem:[%s7562_s5 + $0x650] ss:$8 sps:$4 sm:$0xff]  }
 0x53b   : > { %4040 = vmatpush1.bf16.msra.mxu0 %v5635_v7  ;;  %v5697_v7 = vld [vmem:[%s7562_s5 + $0x664] ss:$8 sps:$4 sm:$0xff]  }
 0x53c   : > { %4041 = vmatprep.subr.bf16.mxu0 %v5640_v14  ;;  %v5695_v14 = vld [vmem:[%s7562_s5 + $0x660] ss:$8 sps:$4 sm:$0xff]  }
 0x53f   : > { %4042 = vmatpush1.bf16.msra.mxu0 %v5638_v20  ;;  %v5700_v20 = vld [vmem:[%s7562_s5 + $0x674] ss:$8 sps:$4 sm:$0xff]  }
 0x540   : > { %4043 = vmatprep.subr.bf16.mxu0 %v5643_v56  ;;  %v5698_v56 = vld [vmem:[%s7562_s5 + $0x670] ss:$8 sps:$4 sm:$0xff]  }
 0x543   : > { %4044 = vmatpush1.bf16.msra.mxu0 %v5641_v22  ;;  %v7259_v46 = vpop.f32.mrb[16].mxu1  ;;  %v5701_v22 = vld [vmem:[%s7562_s5 + $0x680] ss:$8 sps:$4 sm:$0xff]  }
 0x544   : > { %v7264_v23 = vpop.f32.mrb[17].mxu1  ;;  %4045 = vmatprep.subr.bf16.mxu0 %v5646_v48  ;;  %v5706_v48 = vld [vmem:[%s7562_s5 + $0x694] ss:$8 sps:$4 sm:$0xff]  }
 0x545   : > { %v3868_v53 = vpop.f32.mrb[18].mxu1 }
 0x546   : > { %v3869_v51 = vpop.f32.mrb[19].mxu1  ;;  %v5710_v53 = vld [vmem:[%s7562_s5 + $0x6b0] ss:$8 sps:$4 sm:$0xff]  }
 0x547   : > { %4046 = vmatpush1.bf16.msra.mxu0 %v5644_v50  ;;  %v5709_v50 = vld [vmem:[%s7562_s5 + $0x6a4] ss:$8 sps:$4 sm:$0xff]  }
 0x548   : > { %4047 = vmatprep.subr.bf16.mxu0 %v5649_v24  ;;  %v5707_v24 = vld [vmem:[%s7562_s5 + $0x6a0] ss:$8 sps:$4 sm:$0xff]   ;;  %v5715_v51 = vld [vmem:[%s7562_s5 + $0x6c4] ss:$8 sps:$4 sm:$0xff]  }
 0x54b   : > { %4048 = vmatpush1.bf16.msra.mxu0 %v5647_v52  ;;  %v5713_v52 = vld [vmem:[%s7562_s5 + $0x6c0] ss:$8 sps:$4 sm:$0xff]  }
 0x54c   : > { %4049 = vmatprep.subr.bf16.mxu0 %v5652_v63  ;;  %v5718_v63 = vld [vmem:[%s7562_s5 + $0x6d4] ss:$8 sps:$4 sm:$0xff]  }
 0x54f   : > { %4050 = vmatpush1.bf16.msra.mxu0 %v5650_v27  ;;  %v5721_v27 = vld [vmem:[%s7562_s5 + $0x6e4] ss:$8 sps:$4 sm:$0xff]  }
 0x550   : > { %4051 = vmatprep.subr.bf16.mxu0 %v5655_v28  ;;  %v5719_v28 = vld [vmem:[%s7562_s5 + $0x6e0] ss:$8 sps:$4 sm:$0xff]  }
 0x553   : > { %4052 = vmatpush1.bf16.msra.mxu0 %v5653_v29  ;;  %v5722_v29 = vld [vmem:[%s7562_s5 + $0x6f0] ss:$8 sps:$4 sm:$0xff]  }
 0x554   : > { %4053 = vmatprep.subr.bf16.mxu0 %v5658_v57  ;;  %v5727_v57 = vld [vmem:[%s7562_s5 + $0x704] ss:$8 sps:$4 sm:$0xff]  }
 0x557   : > { %4054 = vmatpush1.bf16.msra.mxu0 %v5656_v30  ;;  %v2668_v30 = vpack.c.bf16 %v6946_v21, %v6946_v21 }
 0x558   : > { %4055 = vmatprep.subr.bf16.mxu0 %v5661_v36  ;;  %v5728_v36 = vld [vmem:[%s7562_s5 + $0x714] ss:$8 sps:$4 sm:$0x3f]  }
 0x55b   : > { %4056 = vmatpush1.bf16.msra.mxu0 %v5659_v32  ;;  %v3825_v32 = vsel %vm388_vm0, %v5730_v37, 0 }
 0x55c   : > { %4057 = vmatprep.subr.bf16.mxu0 %v5664_v38  ;;  %v2411_v38 = vpop.permute.xlu1 %2410 }
 0x55d   : > { %v2413_v21 = vsel %vm2412_vm6, %v7370_v59, %v2411_v38 }
 0x55e   : > { %v2670_v39 = vpack.c.bf16 %v2413_v21, %v2413_v21 }
 0x55f   : > { %4058 = vmatpush1.bf16.msra.mxu0 %v5662_v40  ;;  %v5742_v40 = vld [vmem:[%s7564_s7 + $0x58] sm:$0xff]  }
 0x560   : > { %4059 = vmatprep.subr.bf16.mxu0 %v5667_v41  ;;  %v5743_v41 = vld [vmem:[%s7564_s7 + $0x60] ss:$0 sps:$4 sm:$0xff]   ;;  %4293 = vmatpush1.bf16.msra.mxu1 %v5742_v40 }
 0x561   : > { %4294 = vmatprep.subr.bf16.mxu1 %v5812_v2  ;;  %v4268_v34 = vsel %vm4266_vm7, %v5743_v41, 0 }
 0x563   : > { %4060 = vmatpush1.bf16.msra.mxu0 %v5665_v18  ;;  %v2671_v18 = vld [vmem:[%s7563_s6] sm:$0x3] }
 0x564   : > { %4061 = vmatprep.subr.bf16.mxu0 %v5670_v19  ;;  %4295 = vmatpush1.bf16.msra.mxu1 %v4268_v34  ;;  %v3814_v19 = vrot.slane %v2671_v18, %v6106_v31  ;;  %v3818_v43 = vrot.slane %v2671_v18, %v6112_v35  ;;  %v4187_v31 = vld [vmem:[%s7565_s8] sm:$0x1] }
 0x567   : > { %4062 = vmatpush1.bf16.msra.mxu0 %v5668_v25  ;;  %v3865_v25 = vadd.f32 %v7259_v46, %v3814_v19 }
 0x568   : > { %4063 = vmatprep.subr.bf16.mxu0 %v5673_v33  ;;  %v3867_v33 = vadd.f32 %v7264_v23, %v3818_v43 }
 0x56b   : > { %4064 = vmatpush1.bf16.msra.mxu0 %v5671_v45 }
 0x56c   : > { %4065 = vmatprep.subr.bf16.mxu0 %v5676_v47 }
 0x56f   : > { %4066 = vmatpush1.bf16.msra.mxu0 %v5674_v58 }
 0x570   : > { %4076 = vmatprep.subr.bf16.mxu0 %v5679_v55 }
 0x572   : > { %4068 = vmatmul.mubr.bf16.vlgmr.msra.gmra.mrb[16].mxu0 %v2666_v15 }
 0x573   : > { %4077 = vmatpush1.bf16.msra.mxu0 %v5677_v0  ;;  %4108 = vmatprep.mubr.bf16.mxu0 %v2669_v62 }
 0x574   : > { %4078 = vmatprep.subr.bf16.mxu0 %v5682_v60 }
 0x577   : > { %4079 = vmatpush1.bf16.msra.mxu0 %v5680_v5 }
 0x578   : > { %4080 = vmatprep.subr.bf16.mxu0 %v5685_v6 }
 0x57b   : > { %4081 = vmatpush1.bf16.msra.mxu0 %v5683_v54 }
 0x57c   : > { %4082 = vmatprep.subr.bf16.mxu0 %v5688_v8 }
 0x57f   : > { %4083 = vmatpush1.bf16.msra.mxu0 %v5686_v9 }
 0x580   : > { %4084 = vmatprep.subr.bf16.mxu0 %v5691_v11 }
 0x583   : > { %4085 = vmatpush1.bf16.msra.mxu0 %v5689_v13 }
 0x584   : > { %4086 = vmatprep.subr.bf16.mxu0 %v5694_v10 }
 0x587   : > { %4087 = vmatpush1.bf16.msra.mxu0 %v5692_v12 }
 0x588   : > { %4088 = vmatprep.subr.bf16.mxu0 %v5697_v7 }
 0x58b   : > { %4089 = vmatpush1.bf16.msra.mxu0 %v5695_v14 }
 0x58c   : > { %4090 = vmatprep.subr.bf16.mxu0 %v5700_v20 }
 0x58f   : > { %4091 = vmatpush1.bf16.msra.mxu0 %v5698_v56 }
 0x590   : > { %4092 = vmatprep.subr.bf16.mxu0 %v5703_v17 }
 0x593   : > { %4093 = vmatpush1.bf16.msra.mxu0 %v5701_v22 }
 0x594   : > { %4094 = vmatprep.subr.bf16.mxu0 %v5706_v48 }
 0x597   : > { %4095 = vmatpush1.bf16.msra.mxu0 %v5704_v61 }
 0x598   : > { %4096 = vmatprep.subr.bf16.mxu0 %v5709_v50 }
 0x59b   : > { %4097 = vmatpush1.bf16.msra.mxu0 %v5707_v24 }
 0x59c   : > { %4098 = vmatprep.subr.bf16.mxu0 %v5712_v16 }
 0x59f   : > { %4099 = vmatpush1.bf16.msra.mxu0 %v5710_v53 }
 0x5a0   : > { %4100 = vmatprep.subr.bf16.mxu0 %v5715_v51 }
 0x5a3   : > { %4101 = vmatpush1.bf16.msra.mxu0 %v5713_v52 }
 0x5a4   : > { %4102 = vmatprep.subr.bf16.mxu0 %v5718_v63 }
 0x5a7   : > { %4103 = vmatpush1.bf16.msra.mxu0 %v5716_v4 }
 0x5a8   : > { %4104 = vmatprep.subr.bf16.mxu0 %v5721_v27 }
 0x5ab   : > { %4105 = vmatpush1.bf16.msra.mxu0 %v5719_v28 }
 0x5ac   : > { %4106 = vmatprep.subr.bf16.mxu0 %v5724_v1 }
 0x5af   : > { %4107 = vmatpush1.bf16.msra.mxu0 %v5722_v29 }
 0x5b0   : > { %4117 = vmatprep.subr.bf16.mxu0 %v5727_v57 }
 0x5b2   : > { %4109 = vmatmul.mubr.bf16.vlgmr.msra.gmra.mrb[16].mxu0 %v2668_v30 }
 0x5b3   : > { %4118 = vmatpush1.bf16.msra.mxu0 %v5725_v26  ;;  %4149 = vmatprep.mubr.bf16.mxu0 %v5812_v2 }
 0x5b4   : > { %4953 = vmatprep.subr.msk.bf16.mxu0 %vm388_vm0, %v5728_v36  ;;  %vm4310_vm0 = vcmask 73728  }
 0x5b7   : > { %4120 = vmatpush1.bf16.msra.mxu0 %v3825_v32 }
 0x5be   : > { %4954 = vmatmul.mubr.msk.bf16.vlgmr.msra.gmra.mrb[16].mxu0 %vm381_vm1, %v2670_v39 }
 0x691   : > { %v4151_v42 = vpop.f32.mrb[16].mxu0 }
 0x692   : > { %v4978_v44 = vadd.f32 %v4151_v42, %v3865_v25  ;;  %v4153_v45 = vpop.f32.mrb[17].mxu0 }
 0x693   : > { %v4980_v47 = vadd.f32 %v4153_v45, %v3867_v33  ;;  %v4155_v49 = vpop.f32.mrb[18].mxu0 }
 0x694   : > { %v4158_v2 = vmax.f32 %v4978_v44, 0.0  ;;  %v4156_v58 = vpop.f32.mrb[19].mxu0 }
 0x695   : > { %v4159_v55 = vmax.f32 %v4980_v47, 0.0 }
 0x696   : > { %v4185_v3 = vpack.c.bf16 %v4158_v2, %v4158_v2 }
 0x697   : > { %v4186_v59 = vpack.c.bf16 %v4159_v55, %v4159_v55 }
 0x699   : > { %4968 = vmatprep.mubr.msk.bf16.mxu1 %vm2352_vm15, %v4186_v59 }
 0x69a   : > { %4303 = vmatmul.mubr.bf16.vlgmr.msra.gmra.mrb[20].mxu1 %v4185_v3 }
 0x76d   : > { %v4304_v35 = vpop.f32.mrb[20].mxu1 }
 0x76e   : > { %v4305_v46 = vadd.f32 %v4304_v35, %v4187_v31  ;;  %v4306_v23 = vpop.f32.mrb[21].mxu1 }
 0x76f   : > { %v4307_v0 = vpop.f32.mrb[22].mxu1 }
 0x770   : > { %v4308_v15 = vpop.f32.mrb[23].mxu1  ;;  %v4311_v60 = vsel %vm4310_vm0, %v4305_v46, -inf }
 0x771   : > { %4312 = vmax.xlane.f32.xlu0 %v4311_v60 }
 0x7fe   : > { %v4313_v62 = vpop.xlane.xlu0 %4312 }
 0x7ff   : > { %v4314_v5 = vsub.f32 %v4305_v46, %v4313_v62 }
 0x801   : > { %v4315_v6 = vmul.f32 1.442695, %v4314_v5 }
 0x803   : > { %5744 = vpow2.f32 %v4315_v6 }
 0x80d   : > { %v5745_v54 = vpop.eup %5744 }
 0x80e   : > { %v4317_v8 = vsel %vm4310_vm0, %v5745_v54, 0.0 }
 0x80f   : > { %4318 = vadd.xlane.f32.xlu1 %v4317_v8 }
 0x89c   : > { %v4319_v9 = vpop.xlane.xlu1 %4318 }
 0x89d   : > { %5746 = vlog2.f32 %v4319_v9 }
 0x8a7   : > { %v5747_v11 = vpop.eup %5746 }
 0x8a8   : > { %v4321_v13 = vmul.f32 0.6931472, %v5747_v11 }
 0x8aa   : > { %v4322_v10 = vsub.f32 %v4314_v5, %v4321_v13 }
 0x8ac   : > { %4323 = vst.msk [vmem:[%s324_s21] sm:$0x1] %vm4310_vm0, %v4322_v10 }
 0x8ad   : > { %5761 = shalt.err (!%p5758_p3)
}
 0x8ae   : > { %s5762_s14 = scalar_lea.hbm %s7514_s24, 16  ;;  %s5766_s21 = scalar_lea.hbm %s7566_s9, 32 }
 0x8af   : > { %p5763_p4 = scmp.ne.s32.totalorder %s7514_s24, %s5762_s14  ;;  %p5767_p9 = scmp.lt.u32.totalorder %s7514_s24, %s7566_s9 }
 0x8b0   : > { %p5768_p10 = scmp.lt.u32.totalorder %s5766_s21, %s5762_s14  ;;  %p5770_p12 = scmp.lt.u32.totalorder %s5762_s14, %s7514_s24 }
 0x8b1   : > { %p5764_p7 = pnand %p5763_p4, %p5918_p5 }
 0x8b2   : > { %p5769_p11 = por %p5768_p10, %p5767_p9 }
 0x8b3   : > { %p5765_p8 = pneg %p5764_p7 }
 0x8b4   : > { %p5771_p13 = por %p5770_p12, %p5769_p11 }
 0x8b6   : > { %p5772_p0 = pnand %p5771_p13, %p5765_p8 }
 0x8b8   : > { %5775 = shalt.err (!%p5772_p0)
}
 0x8b9   : > { %5033 = dma.vmem_to_hbm [thread:$0]  (%p5918_p5), %s7516_s22, 16, %s7514_s24, %s4325_s26  }
 0x8ba PF: > { %p5039_p1 = scmp.ge.s32.totalorder %s5810_s12, 2  ;;  %s4349_s27 = sand.u32 1, %s5798_s30  }
 0x8bb   : > { %s4350_s13 = scalar_lea.sflag [#allocation3], %s4349_s27 }
 0x8bc   : > { %p5036_p2 = pnand %p5039_p1, %p5922_p6 }
 0x8be   : > { %5793 = dma.done.wait (!%p5036_p2), %s4350_s13, 16  }
 0x8bf   : > { %5795 = vsyncadd (!%p5036_p2), %s4350_s13, 4294967280  ;;  %p19_p3 = scmp.ge.s32.totalorder %s5905_s15, 4   ;;  %s7569_s30 = smov %s5802_s10 }
 0x8c0   : > { %s7570_s10 = smov %s5806_s11  ;;  %s7571_s11 = smov %s5916_s18 }
 0x8c1   : > { %s7572_s12 = smov %s5905_s15  ;;  %21 = sbr.rel (!%p19_p3) target bundleno = 3 (0x3), region = 99 }
 0x8c8   :  { %4354 = vsyncpa [#allocation3], 1 }
 0x8c9   :  { %4356 = vsyncpa [#allocation3 + $0x1], 1 }

</bundles_post_ra>
